<compile_context>
chip_gen: v7x
topology: tpu7x:2x2x1
jax: 0.10.0
libtpu: 0.0.40
codegen_flags: <defaults>
</compile_context>

<pallas_src>
import math

import jax
import jax.numpy as jnp
from jax import lax
from jax.experimental import pallas as pl
from jax.experimental.pallas import tpu as pltpu

# ---- configuration (small, consistent with the module) ----
B = 2            # batch
C = 64           # channels (divisible by 32 for GroupNorm(32, C))
H_SP = 8         # spatial H
W_SP = 8         # spatial W
T = H_SP * W_SP  # tokens per batch element
NUM_HEADS = 2
GROUPS = 32
GS = C // GROUPS          # channels per group
CH = C // NUM_HEADS       # channels per head
BT = B * T                # tokens in the whole batch
EPS = 1e-5                # GroupNorm default eps


def attention_block_kernel(x_ref, wslab_ref, wqkv_ref, bias_ref, o_ref):
    x2 = x_ref[...]                                   # (BT, C) f32
    x3 = x2.reshape(B, T, C)                          # leading-dim split (free)

    wslab = wslab_ref[...]                            # (2C, C)
    gmask = wslab[:C, :]                              # (C, C): group mask / (T*GS)
    wproj = wslab[C:, :]                              # (C, C): Wproj^T
    bias = bias_ref[...]                              # (2, 3C)

    # ---------------- GroupNorm(32, C) stats ----------------
    # Affine (gamma/beta) is folded into the fused QKV weight/bias by the
    # wrapper, so only the per-(batch, group) normalization happens here.
    # One pass: var = E[x^2] - mean^2; group reduction via matmul with gmask.
    s1 = jnp.sum(x3, axis=1)                                          # (B, C)
    s2 = jnp.sum(x3 * x3, axis=1)                                     # (B, C)
    mean = jnp.dot(s1, gmask, preferred_element_type=jnp.float32)     # (B, C)
    ex2 = jnp.dot(s2, gmask, preferred_element_type=jnp.float32)      # (B, C)
    var = ex2 - mean * mean
    rstd = lax.rsqrt(var + EPS)
    xn = ((x3 - mean[:, None, :]) * rstd[:, None, :]).reshape(BT, C)  # (BT, C)

    # ---------------- fused 1x1 conv -> q|k|v ----------------
    # One M=BT, K=C, N=3C matmul; gamma/beta and the attention scale are
    # already folded into wqkv / bias row 0 by the wrapper.
    qkv = jnp.dot(xn, wqkv_ref[...],
                  preferred_element_type=jnp.float32) + bias[0:1, :]  # (BT, 3C)

    # ---------------- attention (batched over B, no mask) ----------------
    acc = jnp.zeros((BT, C), jnp.float32)
    for h in range(NUM_HEADS):                        # unrolled (NUM_HEADS=2)
        lo, hi = h * CH, (h + 1) * CH
        q = qkv[:, lo:hi].reshape(B, T, CH)           # (B, T, CH)
        k = qkv[:, C + lo:C + hi].reshape(B, T, CH)   # (B, T, CH)
        v = qkv[:, 2 * C + lo:2 * C + hi].reshape(B, T, CH)
        # Per-batch scores: (B, T, T) — no cross-batch mask needed.
        w = jnp.einsum('btc,bsc->bts', q, k,
                       preferred_element_type=jnp.float32)
        m = jnp.max(w, axis=-1, keepdims=True)
        e = jnp.exp(w - m)                            # softmax numerator (f32)
        l = jnp.sum(e, axis=-1, keepdims=True)
        o = jnp.einsum('bts,bsc->btc', e, v,
                       preferred_element_type=jnp.float32)            # (B, T, CH)
        # Normalization deferred past PV; exact reciprocal to hold the 1e-4
        # tolerance (approx=True flagged as a correctness risk in review).
        o = o * pl.reciprocal(l, approx=False)
        # Fold proj_out per head (no lane concat of head outputs).
        acc = acc + jnp.dot(o.reshape(BT, CH), wproj[lo:hi, :],
                            preferred_element_type=jnp.float32)       # (BT, C)

    o_ref[...] = x2 + acc + bias[1:2, :C]             # residual + proj bias


@jax.jit
def attention_block(x_nchw, gamma, beta, wqkv, bqkv, wproj, bproj):
    """x_nchw: [B, C, H, W] float32, PyTorch layout. Returns the same shape."""
    b, c, hs, ws = x_nchw.shape
    t = hs * ws
    bt = b * t
    x_btc = jnp.transpose(x_nchw.reshape(b, c, t), (0, 2, 1)).astype(jnp.float32)
    x2d = x_btc.reshape(bt, c)

    # GroupNorm group-membership matrix with 1/(T*GS) folded in.
    grp = jnp.arange(c) // GS
    gmask = (grp[:, None] == grp[None, :]).astype(jnp.float32) / float(t * GS)

    # qkv 1x1-conv weight [3C, C]: out-channel layout is (head, {q,k,v}, ch).
    # Re-pack into a single fused (C_in, 3C) matrix with column blocks
    # [q(head,ch) | k(head,ch) | v(head,ch)].
    scale = 1.0 / math.sqrt(math.sqrt(CH))
    w_r = wqkv.astype(jnp.float32).reshape(NUM_HEADS, 3, CH, c)
    b_r = bqkv.astype(jnp.float32).reshape(NUM_HEADS, 3, CH)
    wq_t = w_r[:, 0].reshape(c, c).T
    wk_t = w_r[:, 1].reshape(c, c).T
    wv_t = w_r[:, 2].reshape(c, c).T
    wqkv_t = jnp.concatenate([wq_t, wk_t, wv_t], axis=1)            # (c, 3c)
    bqkv_row = jnp.concatenate(
        [b_r[:, 0].reshape(c), b_r[:, 1].reshape(c), b_r[:, 2].reshape(c)])

    # Fold the GroupNorm affine into the fused qkv conv:
    #   (y*gamma + beta) @ W + b  ==  y @ (gamma[:,None]*W) + (beta @ W + b)
    g32 = gamma.astype(jnp.float32)
    be32 = beta.astype(jnp.float32)
    bqkv_row = be32 @ wqkv_t + bqkv_row
    wqkv_t = g32[:, None] * wqkv_t
    # Fold the attention scale ch**-0.25 into the q and k output channels.
    col_scale = jnp.concatenate([jnp.full((c,), scale, jnp.float32),
                                 jnp.full((c,), scale, jnp.float32),
                                 jnp.ones((c,), jnp.float32)])
    wqkv_t = wqkv_t * col_scale[None, :]
    bqkv_row = bqkv_row * col_scale

    # proj weight: input channels already ordered (head, ch) -> plain transpose.
    wproj_t = jnp.transpose(wproj).astype(jnp.float32)

    # Pack small operands: [gmask ; Wproj^T] and [bqkv' ; bproj(pad)].
    w_slab = jnp.concatenate([gmask, wproj_t], axis=0)              # (2c, c)
    biases = jnp.zeros((2, 3 * c), jnp.float32)
    biases = biases.at[0, :].set(bqkv_row)
    biases = biases.at[1, :c].set(bproj.astype(jnp.float32))

    out2d = pl.pallas_call(
        attention_block_kernel,
        out_shape=jax.ShapeDtypeStruct((bt, c), jnp.float32),
        grid=(1,),
        in_specs=[
            pl.BlockSpec((bt, c), lambda i: (0, 0)),        # x (BT, C)
            pl.BlockSpec((2 * c, c), lambda i: (0, 0)),     # [gmask ; Wproj^T]
            pl.BlockSpec((c, 3 * c), lambda i: (0, 0)),     # fused Wqkv^T
            pl.BlockSpec((2, 3 * c), lambda i: (0, 0)),     # [bqkv' ; bproj]
        ],
        out_specs=pl.BlockSpec((bt, c), lambda i: (0, 0)),
        compiler_params=pltpu.CompilerParams(dimension_semantics=("arbitrary",)),
    )(x2d, w_slab, wqkv_t, biases)

    return jnp.transpose(out2d.reshape(b, t, c), (0, 2, 1)).reshape(b, c, hs, ws)


def ref_attention_block(x_nchw, gamma, beta, wqkv, bqkv, wproj, bproj):
    """Pure-JAX reference mirroring the PyTorch module semantics exactly."""
    b, c, hs, ws = x_nchw.shape
    t = hs * ws
    x = x_nchw.reshape(b, c, t).astype(jnp.float32)
    # GroupNorm(32, C): stats over (channels-in-group, spatial), biased variance
    xg = x.reshape(b, GROUPS, GS, t)
    mean = xg.mean(axis=(2, 3), keepdims=True)
    var = ((xg - mean) ** 2).mean(axis=(2, 3), keepdims=True)
    xn = ((xg - mean) / jnp.sqrt(var + EPS)).reshape(b, c, t)
    xn = xn * gamma[None, :, None] + beta[None, :, None]
    qkv = jnp.einsum('oc,bct->bot', wqkv, xn) + bqkv[None, :, None]   # (b, 3c, t)
    qkv = qkv.reshape(b * NUM_HEADS, 3 * CH, t)
    q, k, v = jnp.split(qkv, 3, axis=1)
    scale = 1.0 / math.sqrt(math.sqrt(CH))
    w = jnp.einsum('bct,bcs->bts', q * scale, k * scale)
    w = jax.nn.softmax(w, axis=-1)
    h = jnp.einsum('bts,bcs->bct', w, v).reshape(b, c, t)
    h = jnp.einsum('oc,bct->bot', wproj, h) + bproj[None, :, None]
    return (x + h).reshape(b, c, hs, ws)


if __name__ == "__main__":
    key = jax.random.PRNGKey(0)
    kx, kg, kbt, kw, kb, kpw, kpb = jax.random.split(key, 7)

    x = jax.random.normal(kx, (B, C, H_SP, W_SP), dtype=jnp.float32)

    # GroupNorm affine params (perturbed from PyTorch defaults to exercise them)
    gamma = 1.0 + 0.1 * jax.random.normal(kg, (C,), dtype=jnp.float32)
    beta = 0.05 * jax.random.normal(kbt, (C,), dtype=jnp.float32)
    # qkv 1x1 conv: weight [3C, C], bias [3C]
    wqkv = 0.05 * jax.random.normal(kw, (3 * C, C), dtype=jnp.float32)
    bqkv = 0.01 * jax.random.normal(kb, (3 * C,), dtype=jnp.float32)
    # proj_out is zero_module(...) at init; use small nonzero weights here so the
    # attention path actually contributes to the output and gets verified.
    wproj = 0.05 * jax.random.normal(kpw, (C, C), dtype=jnp.float32)
    bproj = 0.01 * jax.random.normal(kpb, (C,), dtype=jnp.float32)

    out = attention_block(x, gamma, beta, wqkv, bqkv, wproj, bproj)
    out = jax.block_until_ready(out)

    ref = ref_attention_block(x, gamma, beta, wqkv, bqkv, wproj, bproj)
    assert out.shape == (B, C, H_SP, W_SP)
    max_err = float(jnp.max(jnp.abs(out - ref)))
    assert jnp.allclose(out, ref, atol=1e-4, rtol=1e-4), max_err

    # Also check the module's actual zero-initialized proj_out (residual-only path).
    wproj0 = jnp.zeros((C, C), jnp.float32)
    bproj0 = jnp.zeros((C,), jnp.float32)
    out0 = jax.block_until_ready(
        attention_block(x, gamma, beta, wqkv, bqkv, wproj0, bproj0))
    ref0 = ref_attention_block(x, gamma, beta, wqkv, bqkv, wproj0, bproj0)
    assert jnp.allclose(out0, ref0, atol=1e-4, rtol=1e-4)

    print("KERNEL_OK")
</pallas_src>

<mosaic_0001>
module attributes {stable_mosaic.version = 11 : i64} {
  func.func @attention_block_kernel(%arg0: i32, %arg1: memref<128x64xf32, #tpu.memory_space<vmem>>, %arg2: memref<128x64xf32, #tpu.memory_space<vmem>>, %arg3: memref<64x192xf32, #tpu.memory_space<vmem>>, %arg4: memref<2x192xf32, #tpu.memory_space<vmem>>, %arg5: memref<128x64xf32, #tpu.memory_space<vmem>>) attributes {dimension_semantics = [#tpu.dimension_semantics<arbitrary>], iteration_bounds = array<i64: 1>, scalar_prefetch = 0 : i64, scratch_operands = 0 : i64, tpu.core_type = #tpu.core_type<tc>, window_params = [{pipeline_mode = #tpu.pipeline_mode<synchronous>, transform_indices = @transform_0, window_bounds = array<i64: 128, 64>}, {pipeline_mode = #tpu.pipeline_mode<synchronous>, transform_indices = @transform_1, window_bounds = array<i64: 128, 64>}, {pipeline_mode = #tpu.pipeline_mode<synchronous>, transform_indices = @transform_2, window_bounds = array<i64: 64, 192>}, {pipeline_mode = #tpu.pipeline_mode<synchronous>, transform_indices = @transform_3, window_bounds = array<i64: 2, 192>}, {pipeline_mode = #tpu.pipeline_mode<synchronous>, transform_indices = @transform_4, window_bounds = array<i64: 128, 64>}]} {
    %c0 = arith.constant 0 : index
    %c0_0 = arith.constant 0 : index
    %0 = vector.load %arg1[%c0, %c0_0] : memref<128x64xf32, #tpu.memory_space<vmem>>, vector<128x64xf32>
    %1 = vector.shape_cast %0 : vector<128x64xf32> to vector<2x64x64xf32>
    %c0_1 = arith.constant 0 : index
    %c0_2 = arith.constant 0 : index
    %2 = vector.load %arg2[%c0_1, %c0_2] : memref<128x64xf32, #tpu.memory_space<vmem>>, vector<128x64xf32>
    %3 = vector.extract_strided_slice %2 {offsets = [0, 0], sizes = [64, 64], strides = [1, 1]} : vector<128x64xf32> to vector<64x64xf32>
    %4 = vector.extract_strided_slice %2 {offsets = [64, 0], sizes = [64, 64], strides = [1, 1]} : vector<128x64xf32> to vector<64x64xf32>
    %c0_3 = arith.constant 0 : index
    %c0_4 = arith.constant 0 : index
    %5 = vector.load %arg4[%c0_3, %c0_4] : memref<2x192xf32, #tpu.memory_space<vmem>>, vector<2x192xf32>
    %cst = arith.constant dense<0.000000e+00> : vector<2x64xf32>
    %6 = vector.multi_reduction <add>, %1, %cst [1] : vector<2x64x64xf32> to vector<2x64xf32>
    %7 = arith.mulf %1, %1 : vector<2x64x64xf32>
    %cst_5 = arith.constant dense<0.000000e+00> : vector<2x64xf32>
    %8 = vector.multi_reduction <add>, %7, %cst_5 [1] : vector<2x64x64xf32> to vector<2x64xf32>
    %cst_6 = arith.constant dense<0.000000e+00> : vector<2x64xf32>
    %9 = tpu.matmul %6, %3, %cst_6 {dimension_numbers = #tpu.dot_dimension_numbers<[1], [0], [0], [1], [0, 0, 1, 1], [], []>} : vector<2x64xf32>, vector<64x64xf32>, vector<2x64xf32> -> vector<2x64xf32>
    %cst_7 = arith.constant dense<0.000000e+00> : vector<2x64xf32>
    %10 = tpu.matmul %8, %3, %cst_7 {dimension_numbers = #tpu.dot_dimension_numbers<[1], [0], [0], [1], [0, 0, 1, 1], [], []>} : vector<2x64xf32>, vector<64x64xf32>, vector<2x64xf32> -> vector<2x64xf32>
    %11 = arith.mulf %9, %9 : vector<2x64xf32>
    %12 = arith.subf %10, %11 : vector<2x64xf32>
    %cst_8 = arith.constant 9.99999974E-6 : f32
    %13 = vector.broadcast %cst_8 : f32 to vector<2x64xf32>
    %14 = arith.addf %12, %13 : vector<2x64xf32>
    %15 = math.rsqrt %14 : vector<2x64xf32>
    %16 = vector.shape_cast %9 : vector<2x64xf32> to vector<2x1x64xf32>
    %17 = vector.broadcast %16 : vector<2x1x64xf32> to vector<2x64x64xf32>
    %18 = arith.subf %1, %17 : vector<2x64x64xf32>
    %19 = vector.shape_cast %15 : vector<2x64xf32> to vector<2x1x64xf32>
    %20 = vector.broadcast %19 : vector<2x1x64xf32> to vector<2x64x64xf32>
    %21 = arith.mulf %18, %20 : vector<2x64x64xf32>
    %22 = vector.shape_cast %21 : vector<2x64x64xf32> to vector<128x64xf32>
    %c0_9 = arith.constant 0 : index
    %c0_10 = arith.constant 0 : index
    %23 = vector.load %arg3[%c0_9, %c0_10] : memref<64x192xf32, #tpu.memory_space<vmem>>, vector<64x192xf32>
    %cst_11 = arith.constant dense<0.000000e+00> : vector<128x192xf32>
    %24 = tpu.matmul %22, %23, %cst_11 {dimension_numbers = #tpu.dot_dimension_numbers<[1], [0], [0], [1], [0, 0, 1, 1], [], []>} : vector<128x64xf32>, vector<64x192xf32>, vector<128x192xf32> -> vector<128x192xf32>
    %25 = vector.extract_strided_slice %5 {offsets = [0, 0], sizes = [1, 192], strides = [1, 1]} : vector<2x192xf32> to vector<1x192xf32>
    %26 = vector.broadcast %25 : vector<1x192xf32> to vector<128x192xf32>
    %27 = arith.addf %24, %26 : vector<128x192xf32>
    %cst_12 = arith.constant 0.000000e+00 : f32
    %28 = vector.broadcast %cst_12 : f32 to vector<128x64xf32>
    %29 = vector.extract_strided_slice %27 {offsets = [0, 0], sizes = [128, 32], strides = [1, 1]} : vector<128x192xf32> to vector<128x32xf32>
    %30 = vector.shape_cast %29 : vector<128x32xf32> to vector<2x64x32xf32>
    %31 = vector.extract_strided_slice %27 {offsets = [0, 64], sizes = [128, 32], strides = [1, 1]} : vector<128x192xf32> to vector<128x32xf32>
    %32 = vector.shape_cast %31 : vector<128x32xf32> to vector<2x64x32xf32>
    %33 = vector.extract_strided_slice %27 {offsets = [0, 128], sizes = [128, 32], strides = [1, 1]} : vector<128x192xf32> to vector<128x32xf32>
    %34 = vector.shape_cast %33 : vector<128x32xf32> to vector<2x64x32xf32>
    "tpu.trace_start"() <{level = 10 : i32, message = "btc,bsc->bts"}> : () -> ()
    %cst_13 = arith.constant dense<0.000000e+00> : vector<2x64x64xf32>
    %35 = tpu.matmul %30, %32, %cst_13 {dimension_numbers = #tpu.dot_dimension_numbers<[2], [2], [1], [1], [0, 0, 0, 1, 1, 1], [0], [0]>} : vector<2x64x32xf32>, vector<2x64x32xf32>, vector<2x64x64xf32> -> vector<2x64x64xf32>
    "tpu.trace_stop"() : () -> ()
    %cst_14 = arith.constant dense<0xFF800000> : vector<2x64xf32>
    %36 = vector.multi_reduction <maximumf>, %35, %cst_14 [2] : vector<2x64x64xf32> to vector<2x64xf32>
    %37 = vector.shape_cast %36 : vector<2x64xf32> to vector<2x64x1xf32>
    %38 = vector.broadcast %37 : vector<2x64x1xf32> to vector<2x64x64xf32>
    %39 = arith.subf %35, %38 : vector<2x64x64xf32>
    %40 = math.exp %39 : vector<2x64x64xf32>
    %cst_15 = arith.constant dense<0.000000e+00> : vector<2x64xf32>
    %41 = vector.multi_reduction <add>, %40, %cst_15 [2] : vector<2x64x64xf32> to vector<2x64xf32>
    %42 = vector.shape_cast %41 : vector<2x64xf32> to vector<2x64x1xf32>
    "tpu.trace_start"() <{level = 10 : i32, message = "bts,bsc->btc"}> : () -> ()
    %cst_16 = arith.constant dense<0.000000e+00> : vector<2x64x32xf32>
    %43 = tpu.matmul %40, %34, %cst_16 {dimension_numbers = #tpu.dot_dimension_numbers<[2], [1], [1], [2], [0, 0, 0, 1, 1, 2], [0], [0]>} : vector<2x64x64xf32>, vector<2x64x32xf32>, vector<2x64x32xf32> -> vector<2x64x32xf32>
    "tpu.trace_stop"() : () -> ()
    %44 = tpu.reciprocal %42 : vector<2x64x1xf32> -> vector<2x64x1xf32>
    %45 = vector.broadcast %44 : vector<2x64x1xf32> to vector<2x64x32xf32>
    %46 = arith.mulf %43, %45 : vector<2x64x32xf32>
    %47 = vector.shape_cast %46 : vector<2x64x32xf32> to vector<128x32xf32>
    %48 = vector.extract_strided_slice %4 {offsets = [0, 0], sizes = [32, 64], strides = [1, 1]} : vector<64x64xf32> to vector<32x64xf32>
    %cst_17 = arith.constant dense<0.000000e+00> : vector<128x64xf32>
    %49 = tpu.matmul %47, %48, %cst_17 {dimension_numbers = #tpu.dot_dimension_numbers<[1], [0], [0], [1], [0, 0, 1, 1], [], []>} : vector<128x32xf32>, vector<32x64xf32>, vector<128x64xf32> -> vector<128x64xf32>
    %50 = arith.addf %28, %49 : vector<128x64xf32>
    %51 = vector.extract_strided_slice %27 {offsets = [0, 32], sizes = [128, 32], strides = [1, 1]} : vector<128x192xf32> to vector<128x32xf32>
    %52 = vector.shape_cast %51 : vector<128x32xf32> to vector<2x64x32xf32>
    %53 = vector.extract_strided_slice %27 {offsets = [0, 96], sizes = [128, 32], strides = [1, 1]} : vector<128x192xf32> to vector<128x32xf32>
    %54 = vector.shape_cast %53 : vector<128x32xf32> to vector<2x64x32xf32>
    %55 = vector.extract_strided_slice %27 {offsets = [0, 160], sizes = [128, 32], strides = [1, 1]} : vector<128x192xf32> to vector<128x32xf32>
    %56 = vector.shape_cast %55 : vector<128x32xf32> to vector<2x64x32xf32>
    "tpu.trace_start"() <{level = 10 : i32, message = "btc,bsc->bts"}> : () -> ()
    %cst_18 = arith.constant dense<0.000000e+00> : vector<2x64x64xf32>
    %57 = tpu.matmul %52, %54, %cst_18 {dimension_numbers = #tpu.dot_dimension_numbers<[2], [2], [1], [1], [0, 0, 0, 1, 1, 1], [0], [0]>} : vector<2x64x32xf32>, vector<2x64x32xf32>, vector<2x64x64xf32> -> vector<2x64x64xf32>
    "tpu.trace_stop"() : () -> ()
    %cst_19 = arith.constant dense<0xFF800000> : vector<2x64xf32>
    %58 = vector.multi_reduction <maximumf>, %57, %cst_19 [2] : vector<2x64x64xf32> to vector<2x64xf32>
    %59 = vector.shape_cast %58 : vector<2x64xf32> to vector<2x64x1xf32>
    %60 = vector.broadcast %59 : vector<2x64x1xf32> to vector<2x64x64xf32>
    %61 = arith.subf %57, %60 : vector<2x64x64xf32>
    %62 = math.exp %61 : vector<2x64x64xf32>
    %cst_20 = arith.constant dense<0.000000e+00> : vector<2x64xf32>
    %63 = vector.multi_reduction <add>, %62, %cst_20 [2] : vector<2x64x64xf32> to vector<2x64xf32>
    %64 = vector.shape_cast %63 : vector<2x64xf32> to vector<2x64x1xf32>
    "tpu.trace_start"() <{level = 10 : i32, message = "bts,bsc->btc"}> : () -> ()
    %cst_21 = arith.constant dense<0.000000e+00> : vector<2x64x32xf32>
    %65 = tpu.matmul %62, %56, %cst_21 {dimension_numbers = #tpu.dot_dimension_numbers<[2], [1], [1], [2], [0, 0, 0, 1, 1, 2], [0], [0]>} : vector<2x64x64xf32>, vector<2x64x32xf32>, vector<2x64x32xf32> -> vector<2x64x32xf32>
    "tpu.trace_stop"() : () -> ()
    %66 = tpu.reciprocal %64 : vector<2x64x1xf32> -> vector<2x64x1xf32>
    %67 = vector.broadcast %66 : vector<2x64x1xf32> to vector<2x64x32xf32>
    %68 = arith.mulf %65, %67 : vector<2x64x32xf32>
    %69 = vector.shape_cast %68 : vector<2x64x32xf32> to vector<128x32xf32>
    %70 = vector.extract_strided_slice %4 {offsets = [32, 0], sizes = [32, 64], strides = [1, 1]} : vector<64x64xf32> to vector<32x64xf32>
    %cst_22 = arith.constant dense<0.000000e+00> : vector<128x64xf32>
    %71 = tpu.matmul %69, %70, %cst_22 {dimension_numbers = #tpu.dot_dimension_numbers<[1], [0], [0], [1], [0, 0, 1, 1], [], []>} : vector<128x32xf32>, vector<32x64xf32>, vector<128x64xf32> -> vector<128x64xf32>
    %72 = arith.addf %50, %71 : vector<128x64xf32>
    %73 = arith.addf %0, %72 : vector<128x64xf32>
    %74 = vector.extract_strided_slice %5 {offsets = [1, 0], sizes = [1, 64], strides = [1, 1]} : vector<2x192xf32> to vector<1x64xf32>
    %75 = vector.broadcast %74 : vector<1x64xf32> to vector<128x64xf32>
    %76 = arith.addf %73, %75 : vector<128x64xf32>
    %c0_23 = arith.constant 0 : index
    %c0_24 = arith.constant 0 : index
    %77 = vector.load %arg5[%c0_23, %c0_24] : memref<128x64xf32, #tpu.memory_space<vmem>>, vector<128x64xf32>
    tpu.vector_store %arg5[%c0_23, %c0_24], %76 {strides = array<i32>} : memref<128x64xf32, #tpu.memory_space<vmem>>, vector<128x64xf32>,
    return
  }
  func.func @transform_0(%arg0: i32) -> (i32, i32) {
    %c0_i32 = arith.constant 0 : i32
    %c0_i32_0 = arith.constant 0 : i32
    %c0_i32_1 = arith.constant 0 : i32
    return %c0_i32, %c0_i32_0 : i32, i32
  }
  func.func @transform_1(%arg0: i32) -> (i32, i32) {
    %c0_i32 = arith.constant 0 : i32
    %c0_i32_0 = arith.constant 0 : i32
    %c0_i32_1 = arith.constant 0 : i32
    return %c0_i32, %c0_i32_0 : i32, i32
  }
  func.func @transform_2(%arg0: i32) -> (i32, i32) {
    %c0_i32 = arith.constant 0 : i32
    %c0_i32_0 = arith.constant 0 : i32
    %c0_i32_1 = arith.constant 0 : i32
    return %c0_i32, %c0_i32_0 : i32, i32
  }
  func.func @transform_3(%arg0: i32) -> (i32, i32) {
    %c0_i32 = arith.constant 0 : i32
    %c0_i32_0 = arith.constant 0 : i32
    %c0_i32_1 = arith.constant 0 : i32
    return %c0_i32, %c0_i32_0 : i32, i32
  }
  func.func @transform_4(%arg0: i32) -> (i32, i32) {
    %c0_i32 = arith.constant 0 : i32
    %c0_i32_0 = arith.constant 0 : i32
    %c0_i32_1 = arith.constant 0 : i32
    return %c0_i32, %c0_i32_0 : i32, i32
  }
}

</mosaic_0001>

<bundles_post_ra>
// kernel: attention_block.1
= control target key start
LH: loop header
LB: loop body
LE: loop exit
PB: predicated region body
PF: predicated region fallthrough
CT: control target
= control target key end

     0   :  { %v3894_v3 = vmov 0.0|0.0   ;;  %vm51_vm0 = vcmask 523264   ;;  %vm3895_vm1 = vmmov 0   ;;  %v3896_v10 = vmov 0.0   ;;  %s5124_s0 = inlined_call_operand.vmem [shape: f32[128,64], index: 0, kind: input, shape index: {}]   ;;  %s5125_s1 = inlined_call_operand.vmem [shape: f32[128,64], index: 1, kind: input, shape index: {}]   ;;  %s5126_s2 = inlined_call_operand.vmem [shape: f32[64,192], index: 2, kind: input, shape index: {}]   ;;  %s5127_s3 = inlined_call_operand.vmem [shape: f32[2,192], index: 3, kind: input, shape index: {}]   ;;  %s5128_s4 = inlined_call_operand.hbm [shape: f32[128,64], index: 4, kind: output, shape index: {}]  }
   0x1   :  { %v34_v0 = vld [vmem:[%s5125_s1] sm:$0xff]  ;;  %v35_v1 = vld [vmem:[%s5125_s1 + $0x8] sm:$0xff]  ;;  %v36_v2 = vld [vmem:[%s5125_s1 + $0x10] sm:$0xff]  ;;  %3354 = vmatprep.subr.bf16.mxu0 %v3894_v3  ;;  %3366 = vmatprep.subr.bf16.mxu1 %v3894_v3 }
   0x2   :  { %v3355_v4 = vpack.c.bf16 %v35_v1, %v34_v0  ;;  %v37_v5 = vld [vmem:[%s5125_s1 + $0x18] sm:$0xff]  ;;  %v38_v6 = vld [vmem:[%s5125_s1 + $0x20] sm:$0xff]  ;;  %v39_v7 = vld [vmem:[%s5125_s1 + $0x28] sm:$0xff]  ;;  %3044 = vmatprep.mubr.msk.f32.mxu0 %vm3895_vm1, %v3896_v10  ;;  %3063 = vmatprep.mubr.msk.f32.mxu1 %vm3895_vm1, %v3896_v10 }
   0x3   :  { %v40_v8 = vld [vmem:[%s5125_s1 + $0x30] sm:$0xff]  ;;  %v41_v9 = vld [vmem:[%s5125_s1 + $0x38] sm:$0xff]  ;;  %v3959_v11 = vld [vmem:[%s5124_s0] sm:$0xff]  ;;  %v3358_v12 = vpack.c.bf16 %v37_v5, %v36_v2  ;;  %v3361_v21 = vpack.c.bf16 %v39_v7, %v38_v6 }
   0x4   :  { %3356 = vmatpush3.bf16.msra.mxu0 %v3355_v4  ;;  %3368 = vmatpush3.bf16.msra.mxu1 %v3355_v4  ;;  %v3965_v13 = vld [vmem:[%s5124_s0 + $0x8] sm:$0xff]  ;;  %v3970_v14 = vld [vmem:[%s5124_s0 + $0x10] sm:$0xff]  ;;  %v3975_v15 = vld [vmem:[%s5124_s0 + $0x18] sm:$0xff]  ;;  %v52_v16 = vsel %vm51_vm0, %v3959_v11, 0.0  ;;  %v3364_v26 = vpack.c.bf16 %v41_v9, %v40_v8  ;;  %v94_v39 = vmul.f32 %v3959_v11, %v3959_v11 }
   0x5   :  { %3357 = vmatprep.subr.bf16.mxu0 %v3894_v3  ;;  %3369 = vmatprep.subr.bf16.mxu1 %v3894_v3  ;;  %v3984_v17 = vld [vmem:[%s5124_s0 + $0x20] sm:$0xff]  ;;  %v3989_v18 = vld [vmem:[%s5124_s0 + $0x28] sm:$0xff]  ;;  %v53_v19 = vsel %vm51_vm0, %v3965_v13, 0.0  ;;  %v55_v20 = vsel %vm51_vm0, %v3970_v14, 0.0  ;;  %v3998_v22 = vld [vmem:[%s5124_s0 + $0x30] sm:$0xff]  ;;  %v57_v30 = vsel %vm51_vm0, %v3975_v15, 0.0  ;;  %v95_v43 = vmul.f32 %v3965_v13, %v3965_v13 }
   0x6   :  { %v4003_v23 = vld [vmem:[%s5124_s0 + $0x40] sm:$0xff]  ;;  %v4008_v24 = vld [vmem:[%s5124_s0 + $0x48] sm:$0xff]  ;;  %v54_v25 = vadd.f32 %v53_v19, %v52_v16  ;;  %v4013_v27 = vld [vmem:[%s5124_s0 + $0x38] sm:$0xff]  ;;  %v59_v40 = vsel %vm51_vm0, %v3984_v17, 0.0  ;;  %v61_v41 = vsel %vm51_vm0, %v3989_v18, 0.0  ;;  %v63_v46 = vsel %vm51_vm0, %v3998_v22, 0.0 }
   0x7   :  { %v4018_v28 = vld [vmem:[%s5124_s0 + $0x50] sm:$0xff]  ;;  %v4023_v29 = vld [vmem:[%s5124_s0 + $0x58] sm:$0xff]  ;;  %v73_v31 = vsel %vm51_vm0, %v4003_v23, 0.0  ;;  %v74_v32 = vsel %vm51_vm0, %v4008_v24, 0.0  ;;  %v4034_v33 = vld [vmem:[%s5124_s0 + $0x60] sm:$0xff]  ;;  %v65_v47 = vsel %vm51_vm0, %v4013_v27, 0.0 }
   0x8   :  { %3359 = vmatpush3.bf16.msra.mxu0 %v3358_v12  ;;  %3371 = vmatpush3.bf16.msra.mxu1 %v3358_v12  ;;  %v4039_v34 = vld [vmem:[%s5124_s0 + $0x68] sm:$0xff]  ;;  %v4044_v35 = vld [vmem:[%s5124_s0 + $0x70] sm:$0xff]  ;;  %v56_v36 = vadd.f32 %v55_v20, %v54_v25  ;;  %v75_v37 = vadd.f32 %v74_v32, %v73_v31  ;;  %v76_v38 = vsel %vm51_vm0, %v4018_v28, 0.0  ;;  %v78_v42 = vsel %vm51_vm0, %v4023_v29, 0.0  ;;  %v4063_v44 = vld [vmem:[%s5124_s0 + $0x78] sm:$0xff] }
   0x9   :  { %3360 = vmatprep.subr.bf16.mxu0 %v3894_v3  ;;  %3372 = vmatprep.subr.bf16.mxu1 %v3894_v3 }
   0xa   :  { %v58_v45 = vadd.f32 %v57_v30, %v56_v36  ;;  %v77_v48 = vadd.f32 %v76_v38, %v75_v37 }
   0xb   :  { %9 = vsyncpa [#allocation3], 0  ;;  %v80_v49 = vsel %vm51_vm0, %v4034_v33, 0.0  ;;  %v82_v50 = vsel %vm51_vm0, %v4039_v34, 0.0  ;;  %v84_v51 = vsel %vm51_vm0, %v4044_v35, 0.0  ;;  %v96_v52 = vmul.f32 %v3970_v14, %v3970_v14  ;;  %s3899_s18 = smov 32  }
   0xc   :  { %3362 = vmatpush3.bf16.msra.mxu0 %v3361_v21  ;;  %3374 = vmatpush3.bf16.msra.mxu1 %v3361_v21  ;;  %v60_v53 = vadd.f32 %v59_v40, %v58_v45  ;;  %v79_v54 = vadd.f32 %v78_v42, %v77_v48  ;;  %v97_v55 = vmul.f32 %v3975_v15, %v3975_v15  ;;  %v110_v56 = vsel %vm51_vm0, %v94_v39, 0.0  ;;  %s3900_s19 = smov 96   ;;  %s3901_s9 = smov [#allocation2]  }
   0xd   :  { %3363 = vmatprep.subr.bf16.mxu0 %v3894_v3  ;;  %3375 = vmatprep.subr.bf16.mxu1 %v3894_v3  ;;  %v86_v57 = vsel %vm51_vm0, %v4063_v44, 0.0  ;;  %v98_v58 = vmul.f32 %v3984_v17, %v3984_v17  ;;  %v102_v59 = vmul.f32 %v4003_v23, %v4003_v23  ;;  %v111_v60 = vsel %vm51_vm0, %v95_v43, 0.0  ;;  %s2685_s10 = sshll.u32 %s3901_s9, 4  ;;  %s2686_s10 = int_to_ptr.vmem [resolvable:$true] %s2685_s10 }
   0xe   :  { %v62_v61 = vadd.f32 %v61_v41, %v60_v53  ;;  %v81_v62 = vadd.f32 %v80_v49, %v79_v54  ;;  %v103_v63 = vmul.f32 %v4008_v24, %v4008_v24  ;;  %v104_v0 = vmul.f32 %v4018_v28, %v4018_v28  ;;  %s3870_s13 = scalar_lea.vmem %s2686_s10, 2048  ;;  %p3875_p1 = scmp.lt.s32.totalorder %s2686_s10, %s2686_s10 }
   0xf   :  { %v99_v1 = vmul.f32 %v3989_v18, %v3989_v18  ;;  %v100_v2 = vmul.f32 %v3998_v22, %v3998_v22  ;;  %v112_v3 = vadd.f32 %v111_v60, %v110_v56  ;;  %v113_v4 = vsel %vm51_vm0, %v96_v52, 0.0  ;;  %p3871_p0 = scmp.ne.s32.totalorder %s2686_s10, %s3870_s13  ;;  %p3876_p2 = scmp.lt.s32.totalorder %s3870_s13, %s3870_s13 }
  0x10   :  { %3365 = vmatpush3.bf16.msra.mxu0 %v3364_v26  ;;  %3377 = vmatpush3.bf16.msra.mxu1 %v3364_v26  ;;  %v64_v5 = vadd.f32 %v63_v46, %v62_v61  ;;  %v83_v6 = vadd.f32 %v82_v50, %v81_v62  ;;  %v105_v7 = vmul.f32 %v4023_v29, %v4023_v29  ;;  %v115_v8 = vsel %vm51_vm0, %v97_v55, 0.0 }
  0x11   :  { %v106_v9 = vmul.f32 %v4034_v33, %v4034_v33  ;;  %v114_v12 = vadd.f32 %v113_v4, %v112_v3  ;;  %v117_v16 = vsel %vm51_vm0, %v98_v58, 0.0  ;;  %v131_v19 = vsel %vm51_vm0, %v102_v59, 0.0  ;;  %p3877_p3 = por %p3876_p2, %p3875_p1 }
  0x12   :  { %v66_v20 = vadd.f32 %v65_v47, %v64_v5  ;;  %v85_v21 = vadd.f32 %v84_v51, %v83_v6  ;;  %v132_v25 = vsel %vm51_vm0, %v103_v63, 0.0  ;;  %v134_v26 = vsel %vm51_vm0, %v104_v0, 0.0 }
  0x13   :  { %v101_v30 = vmul.f32 %v4013_v27, %v4013_v27  ;;  %v107_v31 = vmul.f32 %v4039_v34, %v4039_v34  ;;  %v116_v32 = vadd.f32 %v115_v8, %v114_v12  ;;  %v133_v36 = vadd.f32 %v132_v25, %v131_v19  ;;  %p3878_p4 = pnand %p3877_p3, %p3871_p0 }
  0x14   :  { %v67_v37 = vrot.slane %v66_v20, 4  ;;  %v87_v38 = vadd.f32 %v86_v57, %v85_v21  ;;  %v119_v39 = vsel %vm51_vm0, %v99_v1, 0.0  ;;  %v136_v40 = vsel %vm51_vm0, %v105_v7, 0.0 }
  0x15   :  { %v108_v41 = vmul.f32 %v4044_v35, %v4044_v35  ;;  %v118_v42 = vadd.f32 %v117_v16, %v116_v32  ;;  %v135_v43 = vadd.f32 %v134_v26, %v133_v36  ;;  %v121_v47 = vsel %vm51_vm0, %v100_v2, 0.0 }
  0x16   :  { %v68_v45 = vadd.f32 %v67_v37, %v66_v20  ;;  %v88_v46 = vrot.slane %v87_v38, 4  ;;  %v138_v48 = vsel %vm51_vm0, %v106_v9, 0.0  ;;  %v109_v49 = vmul.f32 %v4063_v44, %v4063_v44 }
  0x17   :  { %v120_v50 = vadd.f32 %v119_v39, %v118_v42  ;;  %v137_v51 = vadd.f32 %v136_v40, %v135_v43  ;;  %v123_v54 = vsel %vm51_vm0, %v101_v30, 0.0  ;;  %v140_v55 = vsel %vm51_vm0, %v107_v31, 0.0  ;;  %v4135_v40 = vld [vmem:[%s5127_s3] sm:$0xf]  ;;  %v406_v42 = vld [vmem:[%s5126_s2 + $0x8] sm:$0xff]  ;;  %v408_v43 = vld [vmem:[%s5126_s2 + $0x18] sm:$0xff] }
  0x18   :  { %v69_v52 = vrot.slane %v68_v45, 2  ;;  %v89_v53 = vadd.f32 %v88_v46, %v87_v38  ;;  %v142_v60 = vsel %vm51_vm0, %v108_v41, 0.0  ;;  %v144_v1 = vsel %vm51_vm0, %v109_v49, 0.0  ;;  %v405_v46 = vld [vmem:[%s5126_s2] sm:$0xff]  ;;  %v410_v49 = vld [vmem:[%s5126_s2 + $0x28] sm:$0xff] }
  0x19   :  { %v122_v56 = vadd.f32 %v121_v47, %v120_v50  ;;  %v139_v57 = vadd.f32 %v138_v48, %v137_v51  ;;  %vm154_vm2 = vcmask 1041409   ;;  %v311_v37 = vlaneseq  ;;  %v407_v47 = vld [vmem:[%s5126_s2 + $0x10] sm:$0xff]  ;;  %v412_v50 = vld [vmem:[%s5126_s2 + $0x38] sm:$0xff] }
  0x1a   :  { %v70_v58 = vadd.f32 %v69_v52, %v68_v45  ;;  %v90_v59 = vrot.slane %v89_v53, 2  ;;  %v3378_v45 = vpack.c.bf16 %v408_v43, %v406_v42  ;;  %v3380_v48 = vpack.c.bf16 %v407_v47, %v405_v46  ;;  %v409_v52 = vld [vmem:[%s5126_s2 + $0x20] sm:$0xff] }
  0x1b   :  { %v124_v61 = vadd.f32 %v123_v54, %v122_v56  ;;  %v141_v62 = vadd.f32 %v140_v55, %v139_v57  ;;  %v4129_v38 = vshrl.u32 %v311_v37, 7  ;;  %v3382_v51 = vpack.c.bf16 %v412_v50, %v410_v49  ;;  %v414_v55 = vld [vmem:[%s5126_s2 + $0x48] sm:$0xff]  ;;  %v416_v56 = vld [vmem:[%s5126_s2 + $0x58] sm:$0xff] }
  0x1c   :  { %v71_v63 = vrot.slane %v70_v58, 1  ;;  %v91_v0 = vadd.f32 %v90_v59, %v89_v53  ;;  %3379 = vmatprep.subr.bf16.mxu0 %v3378_v45  ;;  %3570 = vmatprep.subr.bf16.mxu1 %v3378_v45  ;;  %v411_v53 = vld [vmem:[%s5126_s2 + $0x30] sm:$0xff]  ;;  %v3386_v57 = vpack.c.bf16 %v416_v56, %v414_v55  ;;  %vm673_vm3 = vcmask 261120  }
  0x1d   :  { %v125_v2 = vrot.slane %v124_v61, 4  ;;  %v143_v3 = vadd.f32 %v142_v60, %v141_v62  ;;  %v2646_v39 = vsub.s32 1, %v4129_v38  ;;  %v3384_v54 = vpack.c.bf16 %v411_v53, %v409_v52  ;;  %v415_v59 = vld [vmem:[%s5126_s2 + $0x50] sm:$0xff]  ;;  %v420_v62 = vld [vmem:[%s5126_s2 + $0x78] sm:$0xff]  ;;  %vm4441_vm4 = vmpackc.low %vm673_vm3, %vm673_vm3 }
  0x1e   :  { %v72_v4 = vadd.f32 %v71_v63, %v70_v58  ;;  %v92_v5 = vrot.slane %v91_v0, 1  ;;  %v413_v58 = vld [vmem:[%s5126_s2 + $0x40] sm:$0xff] }
  0x1f   :  { %v126_v6 = vadd.f32 %v125_v2, %v124_v61  ;;  %v145_v7 = vadd.f32 %v144_v1, %v143_v3  ;;  %v4138_v41 = vrot.slane %v4135_v40, %v2646_v39  ;;  %v3388_v60 = vpack.c.bf16 %v415_v59, %v413_v58  ;;  %v418_v61 = vld [vmem:[%s5126_s2 + $0x68] sm:$0xff]  ;;  %v419_v1 = vld [vmem:[%s5126_s2 + $0x70] sm:$0xff] }
  0x20   :  { %v93_v8 = vadd.f32 %v92_v5, %v91_v0  ;;  %v3390_v63 = vpack.c.bf16 %v420_v62, %v418_v61  ;;  %v417_v0 = vld [vmem:[%s5126_s2 + $0x60] sm:$0xff]  ;;  %v3897_v5 = vmov 1966171168   ;;  %s3898_s2 = smov 64  }
  0x21   :  { %v127_v9 = vrot.slane %v126_v6, 2  ;;  %v146_v12 = vrot.slane %v145_v7, 4  ;;  %5130 = vst [vmem:[#allocation5_spill] sm:$0xff] %v4138_v41  ;;  %v3392_v2 = vpack.c.bf16 %v419_v1, %v417_v0  ;;  %v428_v0 = vsub.s32 2, %v4129_v38 }
  0x22   :  { %v155_v16 = vsel %vm154_vm2, %v93_v8, %v72_v4 }
  0x23   :  { %3045 = vmatmul.mubr.msk.f32.vlgmr.msra.gmra.mrb[0].mxu0 %vm51_vm0, %v155_v16  ;;  %v128_v19 = vadd.f32 %v127_v9, %v126_v6  ;;  %v147_v20 = vadd.f32 %v146_v12, %v145_v7  ;;  %v309_v6 = vunpack.c.l.s4 %v3897_v5 }
  0x24   :  { %552 = vmatprep.mubr.f32.mxu0 %v3896_v10  ;;  %3381 = vmatpush1.bf16.msra.mxu0 %v3380_v48 }
  0x25   :  { %v129_v21 = vrot.slane %v128_v19, 1  ;;  %v148_v25 = vrot.slane %v147_v20, 2  ;;  %3383 = vmatprep.subr.bf16.mxu0 %v3382_v51  ;;  %v310_v7 = vunpack.c.0.s8 %v309_v6 }
  0x27   :  { %v149_v26 = vadd.f32 %v148_v25, %v147_v20  ;;  %v130_v30 = vadd.f32 %v129_v21, %v128_v19  ;;  %v313_v9 = vsub.s32 %v310_v7, %v4129_v38 }
  0x28   :  { %3385 = vmatpush1.bf16.msra.mxu0 %v3384_v54 }
  0x29   :  { %v150_v31 = vrot.slane %v149_v26, 1  ;;  %3387 = vmatprep.subr.bf16.mxu0 %v3386_v57 }
  0x2b   :  { %v151_v32 = vadd.f32 %v150_v31, %v149_v26 }
  0x2c   :  { %3389 = vmatpush1.bf16.msra.mxu0 %v3388_v60 }
  0x2d   :  { %v230_v36 = vsel %vm154_vm2, %v151_v32, %v130_v30  ;;  %3391 = vmatprep.subr.bf16.mxu0 %v3390_v63  ;;  %v4190_v30 = vsub.s32 0, %v4129_v38 }
  0x2e   :  { %3064 = vmatmul.mubr.msk.f32.vlgmr.msra.gmra.mrb[0].mxu1 %vm51_vm0, %v230_v36 }
  0x2f   :  { %588 = vmatprep.mubr.f32.mxu1 %v3896_v10  ;;  %3574 = vmatpush1.bf16.msra.mxu1 %v3380_v48  ;;  %v425_v1 = vrot.slane %v4135_v40, %v4190_v30 }
  0x30   :  { %3571 = vmatprep.subr.bf16.mxu1 %v3382_v51  ;;  %3393 = vmatpush1.bf16.msra.mxu0 %v3392_v2 }
  0x33   :  { %3575 = vmatpush1.bf16.msra.mxu1 %v3384_v54 }
  0x34   :  { %3572 = vmatprep.subr.bf16.mxu1 %v3386_v57 }
  0x37   :  { %3576 = vmatpush1.bf16.msra.mxu1 %v3388_v60 }
  0x38   :  { %3573 = vmatprep.subr.bf16.mxu1 %v3390_v63 }
  0x3b   :  { %3577 = vmatpush1.bf16.msra.mxu1 %v3392_v2  ;;  %v429_v2 = vrot.slane %v4135_v40, %v428_v0 }
  0xf6   :  { %v224_v3 = vpop.f32.mrb[0].mxu0 }
  0xf7   :  { %v3046_v4 = vpop.f32.mrb[1].mxu0  ;;  %v303_v8 = vmul.f32 %v224_v3, %v224_v3  ;;  %v314_v20 = vrot.slane %v224_v3, %v313_v9  ;;  %v4247_v3 = vrot.slane %v425_v1, %v4190_v30 }
  0xf8   :  { %v4250_v4 = vrot.slane %v429_v2, %v4190_v30 }
  0xf9   :  { %v315_v25 = vcombine.high %v314_v20, %v314_v20  ;;  %v322_v26 = vrot.slane %v314_v20, %v313_v9 }
  0xfb   :  { %v329_v31 = vrot.slane %v315_v25, %v313_v9  ;;  %v333_v32 = vrot.slane %v322_v26, %v4190_v30 }
  0xfd   :  { %v337_v37 = vrot.slane %v329_v31, %v4190_v30  ;;  %v340_v42 = vsub.f32 %v3959_v11, %v333_v32  ;;  %v346_v43 = vsub.f32 %v3998_v22, %v333_v32  ;;  %v341_v45 = vsub.f32 %v3965_v13, %v333_v32 }
  0xfe   :  { %v347_v46 = vsub.f32 %v4013_v27, %v333_v32  ;;  %v342_v49 = vsub.f32 %v3970_v14, %v333_v32  ;;  %v343_v50 = vsub.f32 %v3975_v15, %v333_v32  ;;  %v344_v53 = vsub.f32 %v3984_v17, %v333_v32 }
  0xff   :  { %v348_v51 = vsub.f32 %v4003_v23, %v337_v37  ;;  %v349_v52 = vsub.f32 %v4008_v24, %v337_v37  ;;  %v350_v11 = vsub.f32 %v4018_v28, %v337_v37  ;;  %v345_v13 = vsub.f32 %v3989_v18, %v333_v32 }
 0x100   :  { %v351_v27 = vsub.f32 %v4023_v29, %v337_v37  ;;  %v352_v55 = vsub.f32 %v4034_v33, %v337_v37  ;;  %v353_v14 = vsub.f32 %v4039_v34, %v337_v37  ;;  %v354_v15 = vsub.f32 %v4044_v35, %v337_v37 }
 0x101   :  { %v299_v12 = vpop.f32.mrb[0].mxu1  ;;  %v355_v23 = vsub.f32 %v4063_v44, %v337_v37 }
 0x102   :  { %v304_v16 = vsub.f32 %v299_v12, %v303_v8  ;;  %v3065_v19 = vpop.f32.mrb[1].mxu1 }
 0x104   :  { %v305_v21 = vadd.f32 1e-05, %v304_v16 }
 0x106   :  { %3724 = vrsqrt.f32 %v305_v21 }
 0x110   :  { %v3725_v36 = vpop.eup %3724 }
 0x111   :  { %v363_v39 = vrot.slane %v3725_v36, %v313_v9 }
 0x113   :  { %v364_v47 = vcombine.high %v363_v39, %v363_v39  ;;  %v371_v48 = vrot.slane %v363_v39, %v313_v9 }
 0x115   :  { %v378_v54 = vrot.slane %v364_v47, %v313_v9  ;;  %v382_v22 = vrot.slane %v371_v48, %v4190_v30 }
 0x117   :  { %v386_v24 = vrot.slane %v378_v54, %v4190_v30  ;;  %v389_v17 = vmul.f32 %v382_v22, %v340_v42  ;;  %v395_v56 = vmul.f32 %v382_v22, %v346_v43  ;;  %v390_v28 = vmul.f32 %v382_v22, %v341_v45 }
 0x118   :  { %v396_v57 = vmul.f32 %v382_v22, %v347_v46  ;;  %v391_v58 = vmul.f32 %v382_v22, %v342_v49  ;;  %v392_v59 = vmul.f32 %v382_v22, %v343_v50  ;;  %v393_v60 = vmul.f32 %v382_v22, %v344_v53 }
 0x119   :  { %2698 = vmatmul.mubr.msk.f32.vlgmr.msra.gmra.mrb[2].mxu0 %vm51_vm0, %v389_v17  ;;  %2704 = vmatmul.mubr.msk.f32.vlgmr.msra.gmra.mrb[2].mxu1 %vm51_vm0, %v395_v56  ;;  %v397_v18 = vmul.f32 %v386_v24, %v348_v51  ;;  %v398_v29 = vmul.f32 %v386_v24, %v349_v52  ;;  %v399_v33 = vmul.f32 %v386_v24, %v350_v11 }
 0x11a   :  { %558 = vmatprep.mubr.f32.mxu0 %v3896_v10  ;;  %594 = vmatprep.mubr.f32.mxu1 %v3896_v10  ;;  %v394_v34 = vmul.f32 %v382_v22, %v345_v13  ;;  %v400_v35 = vmul.f32 %v386_v24, %v351_v27  ;;  %v401_v44 = vmul.f32 %v386_v24, %v352_v55 }
 0x11b   :  { %v402_v61 = vmul.f32 %v386_v24, %v353_v14  ;;  %v403_v62 = vmul.f32 %v386_v24, %v354_v15  ;;  %v404_v63 = vmul.f32 %v386_v24, %v355_v23 }
 0x11d   :  { %2699 = vmatmul.mubr.msk.f32.gmra.mrb[4].mxu0 %vm51_vm0, %v390_v28  ;;  %2705 = vmatmul.mubr.msk.f32.gmra.mrb[4].mxu1 %vm51_vm0, %v396_v57 }
 0x11e   :  { %564 = vmatprep.mubr.f32.mxu0 %v3896_v10  ;;  %600 = vmatprep.mubr.f32.mxu1 %v3896_v10 }
 0x121   :  { %2700 = vmatmul.mubr.msk.f32.gmra.mrb[6].mxu0 %vm51_vm0, %v391_v58  ;;  %2706 = vmatmul.mubr.msk.f32.gmra.mrb[6].mxu1 %vm51_vm0, %v397_v18 }
 0x122   :  { %570 = vmatprep.mubr.f32.mxu0 %v3896_v10  ;;  %606 = vmatprep.mubr.f32.mxu1 %v3896_v10 }
 0x125   :  { %2701 = vmatmul.mubr.msk.f32.gmra.mrb[8].mxu0 %vm51_vm0, %v392_v59  ;;  %2707 = vmatmul.mubr.msk.f32.gmra.mrb[8].mxu1 %vm51_vm0, %v398_v29 }
 0x126   :  { %576 = vmatprep.mubr.f32.mxu0 %v3896_v10  ;;  %612 = vmatprep.mubr.f32.mxu1 %v3896_v10 }
 0x129   :  { %2702 = vmatmul.mubr.msk.f32.gmra.mrb[10].mxu0 %vm51_vm0, %v393_v60  ;;  %2708 = vmatmul.mubr.msk.f32.gmra.mrb[10].mxu1 %vm51_vm0, %v399_v33 }
 0x12a   :  { %582 = vmatprep.mubr.f32.mxu0 %v3896_v10  ;;  %618 = vmatprep.mubr.f32.mxu1 %v3896_v10 }
 0x12d   :  { %2703 = vmatmul.mubr.msk.f32.gmra.mrb[12].mxu0 %vm51_vm0, %v394_v34  ;;  %2709 = vmatmul.mubr.msk.f32.gmra.mrb[12].mxu1 %vm51_vm0, %v400_v35 }
 0x12e   :  { %624 = vmatprep.mubr.f32.mxu1 %v3896_v10 }
 0x131   :  { %2710 = vmatmul.mubr.msk.f32.gmra.mrb[14].mxu1 %vm51_vm0, %v401_v44 }
 0x132   :  { %630 = vmatprep.mubr.f32.mxu1 %v3896_v10 }
 0x135   :  { %2711 = vmatmul.mubr.msk.f32.gmra.mrb[16].mxu1 %vm51_vm0, %v402_v61 }
 0x136   :  { %636 = vmatprep.mubr.f32.mxu1 %v3896_v10 }
 0x139   :  { %2712 = vmatmul.mubr.msk.f32.gmra.mrb[18].mxu1 %vm51_vm0, %v403_v62 }
 0x13a   :  { %642 = vmatprep.mubr.f32.mxu1 %v3896_v10 }
 0x13d   :  { %2713 = vmatmul.mubr.msk.f32.gmra.mrb[20].mxu1 %vm51_vm0, %v404_v63 }
 0x1ec   :  { %v554_v5 = vpop.f32.mrb[2].mxu0  ;;  %v4252_v6 = vpop.f32.mrb[2].mxu1 }
 0x1ed   :  { %v4255_v10 = vadd.f32 %v554_v5, %v4247_v3  ;;  %v556_v7 = vpop.f32.mrb[3].mxu0  ;;  %v592_v38 = vpop.f32.mrb[3].mxu1 }
 0x1ee   :  { %v4258_v8 = vadd.f32 %v556_v7, %v4250_v4  ;;  %v4261_v40 = vadd.f32 %v592_v38, %v4250_v4  ;;  %v4368_v7 = vadd.f32 %v4252_v6, %v4247_v3 }
 0x1ef   :  { %3082 = vmatprep.mubr.msk.f32.mxu1 %vm673_vm3, %v4255_v10 }
 0x1f0   :  { %v560_v9 = vpop.f32.mrb[4].mxu0  ;;  %v596_v12 = vpop.f32.mrb[4].mxu1 }
 0x1f1   :  { %v4266_v16 = vadd.f32 %v560_v9, %v4247_v3  ;;  %v562_v19 = vpop.f32.mrb[5].mxu0  ;;  %v598_v20 = vpop.f32.mrb[5].mxu1  ;;  %v4352_v61 = vadd.f32 %v596_v12, %v4247_v3 }
 0x1f2   :  { %v4269_v21 = vadd.f32 %v562_v19, %v4250_v4  ;;  %v4272_v25 = vadd.f32 %v598_v20, %v4250_v4 }
 0x1f3   :  { %v4276_v26 = vpack.i.bf16 %v4266_v16, %v4255_v10  ;;  %v3619_v19 = vpack.i.bf16 %v4352_v61, %v4368_v7 }
 0x1f4   :  { %v3684_v30 = vpack.i.bf16 %v4269_v21, %v4258_v8  ;;  %v3442_v31 = vpack.c.bf16 %v4269_v21, %v4258_v8  ;;  %v3699_v32 = vpack.i.bf16 %v4272_v25, %v4261_v40  ;;  %v4286_v36 = vpack.c.bf16 %v4272_v25, %v4261_v40  ;;  %v566_v37 = vpop.f32.mrb[6].mxu0  ;;  %v602_v39 = vpop.f32.mrb[6].mxu1 }
 0x1f5   :  { %v568_v42 = vpop.f32.mrb[7].mxu0  ;;  %v604_v43 = vpop.f32.mrb[7].mxu1  ;;  %3605 = vrot.lane.b32.xlu0 %v4276_v26, %s3898_s2  ;;  %v4297_v49 = vadd.f32 %v566_v37, %v4247_v3  ;;  %v4326_v24 = vadd.f32 %v602_v39, %v4247_v3 }
 0x1f6   :  { %v4291_v45 = vadd.f32 %v568_v42, %v4250_v4  ;;  %v4294_v46 = vadd.f32 %v604_v43, %v4250_v4  ;;  %3443 = vmatprep.subr.bf16.mxu0 %v3442_v31 }
 0x1f7   :  { %3445 = vmatpush3.bf16.msra.mxu0 %v3442_v31 }
 0x1f8   :  { %v572_v47 = vpop.f32.mrb[8].mxu0  ;;  %v608_v48 = vpop.f32.mrb[8].mxu1 }
 0x1f9   :  { %v4300_v50 = vadd.f32 %v572_v47, %v4247_v3  ;;  %v574_v51 = vpop.f32.mrb[9].mxu0  ;;  %v610_v52 = vpop.f32.mrb[9].mxu1  ;;  %v4309_v54 = vadd.f32 %v608_v48, %v4247_v3 }
 0x1fa   :  { %v4303_v53 = vadd.f32 %v574_v51, %v4250_v4  ;;  %v4306_v11 = vadd.f32 %v610_v52, %v4250_v4 }
 0x1fb   :  { %v4313_v22 = vpack.i.bf16 %v4300_v50, %v4297_v49  ;;  %v3624_v58 = vpack.i.bf16 %v4309_v54, %v4326_v24 }
 0x1fc   :  { %v3689_v13 = vpack.i.bf16 %v4303_v53, %v4291_v45  ;;  %v3446_v27 = vpack.c.bf16 %v4303_v53, %v4291_v45  ;;  %v3704_v55 = vpack.i.bf16 %v4306_v11, %v4294_v46  ;;  %v4323_v14 = vpack.c.bf16 %v4306_v11, %v4294_v46  ;;  %v578_v15 = vpop.f32.mrb[10].mxu0  ;;  %v614_v23 = vpop.f32.mrb[10].mxu1 }
 0x1fd   :  { %v580_v17 = vpop.f32.mrb[11].mxu0  ;;  %v616_v56 = vpop.f32.mrb[11].mxu1  ;;  %3610 = vrot.lane.b32.xlu0 %v4313_v22, %s3898_s2  ;;  %v4339_v18 = vadd.f32 %v578_v15, %v4247_v3  ;;  %v4381_v6 = vadd.f32 %v614_v23, %v4247_v3 }
 0x1fe   :  { %v4331_v28 = vadd.f32 %v580_v17, %v4250_v4  ;;  %v4334_v57 = vadd.f32 %v616_v56, %v4250_v4  ;;  %3447 = vmatprep.subr.bf16.mxu0 %v3446_v27 }
 0x1ff   :  { %3449 = vmatpush3.bf16.msra.mxu0 %v3446_v27 }
 0x200   :  { %v584_v59 = vpop.f32.mrb[12].mxu0  ;;  %v620_v60 = vpop.f32.mrb[12].mxu1 }
 0x201   :  { %v4342_v29 = vadd.f32 %v584_v59, %v4247_v3  ;;  %v586_v33 = vpop.f32.mrb[13].mxu0  ;;  %v622_v34 = vpop.f32.mrb[13].mxu1  ;;  %3625 = vrot.lane.b32.xlu0 %v3624_v58, %s3898_s2  ;;  %v4375_v12 = vadd.f32 %v620_v60, %v4247_v3 }
 0x202   :  { %v4346_v35 = vadd.f32 %v586_v33, %v4250_v4  ;;  %v4349_v44 = vadd.f32 %v622_v34, %v4250_v4 }
 0x203   :  { %v3614_v62 = vpack.i.bf16 %v4342_v29, %v4339_v18  ;;  %v3629_v43 = vpack.i.bf16 %v4375_v12, %v4381_v6 }
 0x204   :  { %v3694_v63 = vpack.i.bf16 %v4346_v35, %v4331_v28  ;;  %v3450_v0 = vpack.c.bf16 %v4346_v35, %v4331_v28  ;;  %v3709_v1 = vpack.i.bf16 %v4349_v44, %v4334_v57  ;;  %v4364_v2 = vpack.c.bf16 %v4349_v44, %v4334_v57  ;;  %v626_v5 = vpop.f32.mrb[14].mxu1 }
 0x205   :  { %v628_v38 = vpop.f32.mrb[15].mxu1  ;;  %3615 = vrot.lane.b32.xlu1 %v3614_v62, %s3898_s2  ;;  %v4384_v31 = vadd.f32 %v626_v5, %v4247_v3 }
 0x206   :  { %v4372_v9 = vadd.f32 %v628_v38, %v4250_v4  ;;  %3451 = vmatprep.subr.bf16.mxu0 %v3450_v0 }
 0x207   :  { %3453 = vmatpush3.bf16.msra.mxu0 %v3450_v0 }
 0x208   :  { %v632_v20 = vpop.f32.mrb[16].mxu1  ;;  %3455 = vmatprep.subr.bf16.mxu0 %v4286_v36 }
 0x209   :  { %v4387_v37 = vadd.f32 %v632_v20, %v4247_v3  ;;  %v634_v39 = vpop.f32.mrb[17].mxu1  ;;  %3620 = vrot.lane.b32.xlu1 %v3619_v19, %s3898_s2 }
 0x20a   :  { %v4391_v42 = vadd.f32 %v634_v39, %v4250_v4 }
 0x20b   :  { %3457 = vmatpush3.bf16.msra.mxu0 %v4286_v36  ;;  %v3634_v47 = vpack.i.bf16 %v4387_v37, %v4384_v31 }
 0x20c   :  { %v3714_v48 = vpack.i.bf16 %v4391_v42, %v4372_v9  ;;  %v4402_v51 = vpack.c.bf16 %v4391_v42, %v4372_v9  ;;  %v638_v52 = vpop.f32.mrb[18].mxu1 }
 0x20d   :  { %v640_v27 = vpop.f32.mrb[19].mxu1  ;;  %3630 = vrot.lane.b32.xlu1 %v3629_v43, %s3898_s2  ;;  %3635 = vrot.lane.b32.xlu0 %v3634_v47, %s3898_s2  ;;  %v4410_v23 = vadd.f32 %v638_v52, %v4247_v3 }
 0x20e   :  { %v4407_v36 = vadd.f32 %v640_v27, %v4250_v4 }
 0x210   :  { %v644_v15 = vpop.f32.mrb[20].mxu1 }
 0x211   :  { %v4413_v17 = vadd.f32 %v644_v15, %v4247_v3  ;;  %v646_v56 = vpop.f32.mrb[21].mxu1  ;;  %3645 = vrot.lane.b32.xlu0 %v4276_v26, %s3899_s18 }
 0x212   :  { %v4417_v59 = vadd.f32 %v646_v56, %v4250_v4 }
 0x213   :  { %v3639_v60 = vpack.i.bf16 %v4413_v17, %v4410_v23 }
 0x214   :  { %v3719_v33 = vpack.i.bf16 %v4417_v59, %v4407_v36  ;;  %v4425_v34 = vpack.c.bf16 %v4417_v59, %v4407_v36 }
 0x215   :  { %3640 = vrot.lane.b32.xlu1 %v3639_v60, %s3898_s2  ;;  %3655 = vrot.lane.b32.xlu0 %v3614_v62, %s3899_s18 }
 0x219   :  { %3650 = vrot.lane.b32.xlu1 %v4313_v22, %s3899_s18  ;;  %3665 = vrot.lane.b32.xlu0 %v3619_v19, %s3899_s18 }
 0x21d   :  { %3660 = vrot.lane.b32.xlu1 %v3624_v58, %s3899_s18  ;;  %3670 = vrot.lane.b32.xlu0 %v3629_v43, %s3899_s18 }
 0x221   :  { %3675 = vrot.lane.b32.xlu0 %v3634_v47, %s3899_s18 }
 0x225   :  { %1406 = vrot.lane.b32.xlu0 %v4255_v10, %s3900_s19 }
 0x229   :  { %1408 = vrot.lane.b32.xlu0 %v4266_v16, %s3900_s19 }
 0x22d   :  { %1410 = vrot.lane.b32.xlu0 %v4297_v49, %s3900_s19 }
 0x231   :  { %1412 = vrot.lane.b32.xlu0 %v4300_v50, %s3900_s19 }
 0x235   :  { %1414 = vrot.lane.b32.xlu0 %v4339_v18, %s3900_s19 }
 0x239   :  { %3680 = vrot.lane.b32.xlu0 %v3639_v60, %s3899_s18 }
 0x267   :  { %v3606_v3 = vpop.permute.xlu0 %3605 }
 0x268   :  { %v3608_v4 = vunpack.i.h.bf16 %v3606_v3  ;;  %v3607_v26 = vunpack.i.l.bf16 %v3606_v3 }
 0x26a   :  { %v3394_v22 = vpack.c.bf16 %v3608_v4, %v3607_v26 }
 0x26c   :  { %3396 = vmatprep.subr.msk.bf16.mxu1 %vm4441_vm4, %v3394_v22 }
 0x26d   :  { %3399 = vmatpush3.bf16.xpose.msk.msra.mxu1 %vm4441_vm4, %v3394_v22 }
 0x26f   :  { %v3611_v58 = vpop.permute.xlu0 %3610 }
 0x270   :  { %v3613_v62 = vunpack.i.h.bf16 %v3611_v58  ;;  %v3612_v0 = vunpack.i.l.bf16 %v3611_v58 }
 0x272   :  { %v3400_v5 = vpack.c.bf16 %v3613_v62, %v3612_v0 }
 0x273   :  { %v3626_v43 = vpop.permute.xlu0 %3625 }
 0x274   :  { %3402 = vmatprep.subr.msk.bf16.mxu1 %vm4441_vm4, %v3400_v5  ;;  %v3628_v60 = vunpack.i.h.bf16 %v3626_v43  ;;  %v3627_v3 = vunpack.i.l.bf16 %v3626_v43 }
 0x275   :  { %3405 = vmatpush3.bf16.xpose.msk.msra.mxu1 %vm4441_vm4, %v3400_v5 }
 0x276   :  { %v3418_v26 = vpack.c.bf16 %v3628_v60, %v3627_v3 }
 0x277   :  { %v3616_v38 = vpop.permute.xlu1 %3615 }
 0x278   :  { %v3618_v19 = vunpack.i.h.bf16 %v3616_v38  ;;  %v3617_v20 = vunpack.i.l.bf16 %v3616_v38 }
 0x27a   :  { %v3406_v39 = vpack.c.bf16 %v3618_v19, %v3617_v20 }
 0x27b   :  { %v3621_v47 = vpop.permute.xlu1 %3620 }
 0x27c   :  { %v3623_v52 = vunpack.i.h.bf16 %v3621_v47  ;;  %v3622_v27 = vunpack.i.l.bf16 %v3621_v47  ;;  %3408 = vmatprep.subr.msk.bf16.mxu1 %vm4441_vm4, %v3406_v39 }
 0x27d   :  { %3411 = vmatpush3.bf16.xpose.msk.msra.mxu1 %vm4441_vm4, %v3406_v39 }
 0x27e   :  { %v3412_v15 = vpack.c.bf16 %v3623_v52, %v3622_v27 }
 0x27f   :  { %v3636_v56 = vpop.permute.xlu0 %3635  ;;  %v3631_v62 = vpop.permute.xlu1 %3630 }
 0x280   :  { %3414 = vmatprep.subr.msk.bf16.mxu1 %vm4441_vm4, %v3412_v15  ;;  %v3633_v5 = vunpack.i.h.bf16 %v3631_v62  ;;  %v3632_v38 = vunpack.i.l.bf16 %v3631_v62  ;;  %v3638_v20 = vunpack.i.h.bf16 %v3636_v56  ;;  %v3637_v39 = vunpack.i.l.bf16 %v3636_v56 }
 0x282   :  { %v3424_v19 = vpack.c.bf16 %v3633_v5, %v3632_v38  ;;  %v3430_v43 = vpack.c.bf16 %v3638_v20, %v3637_v39 }
 0x283   :  { %v3646_v4 = vpop.permute.xlu0 %3645 }
 0x284   :  { %v3648_v22 = vunpack.i.h.bf16 %v3646_v4  ;;  %v3647_v58 = vunpack.i.l.bf16 %v3646_v4 }
 0x285   :  { %3417 = vmatpush3.bf16.xpose.msk.msra.mxu1 %vm4441_vm4, %v3412_v15 }
 0x286   :  { %v4461_v0 = vpack.c.bf16 %v3648_v22, %v3647_v58  ;;  %3420 = vmatprep.subr.msk.bf16.mxu1 %vm4441_vm4, %v3418_v26 }
 0x288   :  { %3476 = vmatprep.subr.msk.bf16.mxu0 %vm4441_vm4, %v4461_v0 }
 0x28c   :  { %3083 = vmatmul.mubr.msk.f32.vlgmr.msra.gmra.mrb[22].mxu1 %vm673_vm3, %v4266_v16  ;;  %v3641_v16 = vpop.permute.xlu1 %3640 }
 0x28d   :  { %3085 = vmatprep.mubr.msk.f32.mxu1 %vm673_vm3, %v4297_v49  ;;  %3423 = vmatpush3.bf16.xpose.msk.msra.mxu1 %vm4441_vm4, %v3418_v26  ;;  %v3643_v49 = vunpack.i.h.bf16 %v3641_v16  ;;  %v3642_v47 = vunpack.i.l.bf16 %v3641_v16 }
 0x28e   :  { %3426 = vmatprep.subr.msk.bf16.mxu1 %vm4441_vm4, %v3424_v19 }
 0x290   :  { %3086 = vmatmul.mubr.msk.f32.gmra.mrb[24].mxu1 %vm673_vm3, %v4300_v50  ;;  %v3436_v50 = vpack.c.bf16 %v3643_v49, %v3642_v47 }
 0x291   :  { %3088 = vmatprep.mubr.msk.f32.mxu1 %vm673_vm3, %v4339_v18  ;;  %v4499_v18 = vpop.permute.xlu1 %3650 }
 0x294   :  { %3089 = vmatmul.mubr.msk.f32.gmra.mrb[26].mxu1 %vm673_vm3, %v4342_v29 }
 0x295   :  { %3091 = vmatprep.mubr.msk.f32.mxu1 %vm673_vm3, %v4368_v7  ;;  %3429 = vmatpush3.bf16.xpose.msk.msra.mxu1 %vm4441_vm4, %v3424_v19  ;;  %v3661_v52 = vpop.permute.xlu1 %3660 }
 0x296   :  { %3432 = vmatprep.subr.msk.bf16.mxu1 %vm4441_vm4, %v3430_v43  ;;  %v3663_v27 = vunpack.i.h.bf16 %v3661_v52  ;;  %v3662_v15 = vunpack.i.l.bf16 %v3661_v52 }
 0x298   :  { %3092 = vmatmul.mubr.msk.f32.gmra.mrb[28].mxu1 %vm673_vm3, %v4352_v61 }
 0x299   :  { %3110 = vmatprep.mubr.msk.f32.mxu1 %vm673_vm3, %v4326_v24 }
 0x29d   :  { %3435 = vmatpush3.bf16.xpose.msk.msra.mxu1 %vm4441_vm4, %v3430_v43 }
 0x29e   :  { %3438 = vmatprep.subr.msk.bf16.mxu1 %vm4441_vm4, %v3436_v50 }
 0x2a5   :  { %3441 = vmatpush3.bf16.xpose.msk.msra.mxu1 %vm4441_vm4, %v3436_v50 }
 0x2a6   :  { %3459 = vmatprep.subr.bf16.mxu1 %v4323_v14 }
 0x2ac   :  { %3111 = vmatmul.mubr.msk.f32.vlgmr.msra.gmra.mrb[30].mxu1 %vm673_vm3, %v4309_v54 }
 0x2ad   :  { %3113 = vmatprep.mubr.msk.f32.mxu1 %vm673_vm3, %v4381_v6  ;;  %3461 = vmatpush3.bf16.msra.mxu1 %v4323_v14  ;;  %v4519_v14 = vpack.c.bf16 %v3663_v27, %v3662_v15 }
 0x2ae   :  { %3463 = vmatprep.subr.bf16.mxu1 %v4364_v2 }
 0x2b0   :  { %3114 = vmatmul.mubr.msk.f32.gmra.mrb[32].mxu1 %vm673_vm3, %v4375_v12 }
 0x2b1   :  { %3116 = vmatprep.mubr.msk.f32.mxu1 %vm673_vm3, %v4384_v31  ;;  %3465 = vmatpush3.bf16.msra.mxu1 %v4364_v2 }
 0x2b2   :  { %3467 = vmatprep.subr.bf16.mxu1 %v4402_v51 }
 0x2b4   :  { %3117 = vmatmul.mubr.msk.f32.gmra.mrb[34].mxu1 %vm673_vm3, %v4387_v37 }
 0x2b5   :  { %3119 = vmatprep.mubr.msk.f32.mxu1 %vm673_vm3, %v4410_v23  ;;  %3469 = vmatpush3.bf16.msra.mxu1 %v4402_v51 }
 0x2b6   :  { %3471 = vmatprep.subr.bf16.mxu1 %v4425_v34 }
 0x2b8   :  { %3120 = vmatmul.mubr.msk.f32.gmra.mrb[36].mxu1 %vm673_vm3, %v4413_v17 }
 0x2b9   :  { %3473 = vmatpush3.bf16.msra.mxu1 %v4425_v34 }
 0x2ba   :  { %3500 = vmatprep.subr.msk.bf16.mxu1 %vm4441_vm4, %v4519_v14 }
 0x35f   :  { %v4527_v2 = vpop.f32.mrb[22].mxu1 }
 0x360   :  { %v4529_v56 = vpop.f32.mrb[23].mxu1  ;;  %v975_v51 = vsel %vm51_vm0, %v4527_v2, -inf }
 0x361   :  { %976 = vmax.xlane.f32.xlu1 %v975_v51  ;;  %v972_v60 = vsel %vm51_vm0, %v4529_v56, -inf }
 0x362   :  { %973 = vmax.xlane.f32.xlu0 %v972_v60 }
 0x363   :  { %v4535_v3 = vpop.f32.mrb[24].mxu1 }
 0x364   :  { %v4537_v4 = vpop.f32.mrb[25].mxu1  ;;  %v981_v34 = vsel %vm51_vm0, %v4535_v3, -inf }
 0x365   :  { %v978_v26 = vsel %vm51_vm0, %v4537_v4, -inf }
 0x366   :  { %982 = vmax.xlane.f32.xlu0 %v981_v34  ;;  %979 = vmax.xlane.f32.xlu1 %v978_v26 }
 0x367   :  { %v4543_v22 = vpop.f32.mrb[26].mxu1 }
 0x368   :  { %v4545_v58 = vpop.f32.mrb[27].mxu1  ;;  %v987_v62 = vsel %vm51_vm0, %v4543_v22, -inf }
 0x369   :  { %v984_v5 = vsel %vm51_vm0, %v4545_v58, -inf }
 0x36a   :  { %988 = vmax.xlane.f32.xlu0 %v987_v62  ;;  %985 = vmax.xlane.f32.xlu1 %v984_v5 }
 0x36b   :  { %v4551_v38 = vpop.f32.mrb[28].mxu1 }
 0x36c   :  { %v4553_v19 = vpop.f32.mrb[29].mxu1  ;;  %v993_v20 = vsel %vm51_vm0, %v4551_v38, -inf }
 0x36d   :  { %v990_v39 = vsel %vm51_vm0, %v4553_v19, -inf }
 0x36e   :  { %994 = vmax.xlane.f32.xlu1 %v993_v20  ;;  %v4593_v20 = vpop.permute.xlu0 %3655 }
 0x372   :  { %991 = vmax.xlane.f32.xlu1 %v990_v39  ;;  %v4595_v39 = vpop.permute.xlu0 %3665 }
 0x37f   :  { %v4559_v43 = vpop.f32.mrb[30].mxu1 }
 0x380   :  { %v4561_v16 = vpop.f32.mrb[31].mxu1  ;;  %v999_v49 = vsel %vm51_vm0, %v4559_v43, -inf }
 0x381   :  { %1000 = vmax.xlane.f32.xlu0 %v999_v49  ;;  %v996_v52 = vsel %vm51_vm0, %v4561_v16, -inf }
 0x383   :  { %v4565_v47 = vpop.f32.mrb[32].mxu1 }
 0x384   :  { %v4567_v50 = vpop.f32.mrb[33].mxu1  ;;  %v1005_v60 = vsel %vm51_vm0, %v4565_v47, -inf }
 0x385   :  { %997 = vmax.xlane.f32.xlu0 %v996_v52  ;;  %v1002_v27 = vsel %vm51_vm0, %v4567_v50, -inf  ;;  %v4599_v52 = vpop.permute.xlu0 %3670 }
 0x386   :  { %1003 = vmax.xlane.f32.xlu1 %v1002_v27 }
 0x387   :  { %v4573_v15 = vpop.f32.mrb[34].mxu1 }
 0x388   :  { %v4575_v51 = vpop.f32.mrb[35].mxu1  ;;  %v1011_v5 = vsel %vm51_vm0, %v4573_v15, -inf }
 0x389   :  { %1006 = vmax.xlane.f32.xlu0 %v1005_v60  ;;  %v1008_v34 = vsel %vm51_vm0, %v4575_v51, -inf }
 0x38a   :  { %1009 = vmax.xlane.f32.xlu1 %v1008_v34 }
 0x38b   :  { %v4581_v26 = vpop.f32.mrb[36].mxu1 }
 0x38c   :  { %v4583_v62 = vpop.f32.mrb[37].mxu1  ;;  %v1017_v49 = vsel %vm51_vm0, %v4581_v26, -inf }
 0x38d   :  { %1012 = vmax.xlane.f32.xlu0 %v1011_v5  ;;  %v1014_v27 = vsel %vm51_vm0, %v4583_v62, -inf }
 0x39b   :  { %1416 = vrot.lane.b32.xlu1 %v4342_v29, %s3900_s19  ;;  %v4603_v29 = vpop.permute.xlu0 %3675 }
 0x3a3   :  { %1418 = vrot.lane.b32.xlu0 %v4368_v7, %s3900_s19  ;;  %v4605_v7 = vpop.permute.xlu0 %1406 }
 0x3a7   :  { %1420 = vrot.lane.b32.xlu0 %v4352_v61, %s3900_s19  ;;  %v4609_v61 = vpop.permute.xlu0 %1408 }
 0x3ab   :  { %v4615_v60 = vpop.permute.xlu0 %1410 }
 0x3af   :  { %v4623_v34 = vpop.permute.xlu0 %1412 }
 0x3b3   :  { %v4637_v8 = vpop.permute.xlu0 %1414 }
 0x3b7   :  { %v4645_v21 = vpop.permute.xlu0 %3680 }
 0x3bf   :  { %1018 = vmax.xlane.f32.xlu1 %v1017_v49 }
 0x3c6   :  { %1015 = vmax.xlane.f32.xlu0 %v1014_v27  ;;  %v3667_v27 = vunpack.i.l.bf16 %v4595_v39 }
 0x3d0   :  { %1579 = vrot.lane.b32.xlu1 %v4381_v6, %s3900_s19 }
 0x3d4   :  { %1583 = vrot.lane.b32.xlu1 %v4384_v31, %s3900_s19 }
 0x3d8   :  { %1587 = vrot.lane.b32.xlu1 %v4410_v23, %s3900_s19  ;;  %v3653_v23 = vunpack.i.h.bf16 %v4499_v18 }
 0x3dc   :  { %3685 = vrot.lane.b32.xlu1 %v3684_v30, %s3900_s19  ;;  %1575 = vrot.lane.b32.xlu0 %v4326_v24, %s3900_s19 }
 0x3e0   :  { %3695 = vrot.lane.b32.xlu1 %v3694_v63, %s3900_s19  ;;  %1577 = vrot.lane.b32.xlu0 %v4309_v54, %s3900_s19 }
 0x3e4   :  { %3700 = vrot.lane.b32.xlu1 %v3699_v32, %s3900_s19  ;;  %1581 = vrot.lane.b32.xlu0 %v4375_v12, %s3900_s19 }
 0x3e8   :  { %3710 = vrot.lane.b32.xlu1 %v3709_v1, %s3900_s19  ;;  %1585 = vrot.lane.b32.xlu0 %v4387_v37, %s3900_s19 }
 0x3ec   :  { %1589 = vrot.lane.b32.xlu0 %v4413_v17, %s3900_s19  ;;  %v3652_v17 = vunpack.i.l.bf16 %v4499_v18 }
 0x3ee   :  { %v977_v40 = vpop.xlane.xlu1 %976 }
 0x3ef   :  { %v1021_v25 = vsub.f32 %v4527_v2, %v977_v40  ;;  %v974_v30 = vpop.xlane.xlu0 %973 }
 0x3f0   :  { %v1020_v32 = vsub.f32 %v4529_v56, %v974_v30  ;;  %3690 = vrot.lane.b32.xlu0 %v3689_v13, %s3900_s19  ;;  %v3480_v56 = vpack.c.bf16 %v3653_v23, %v3652_v17  ;;  %v3678_v23 = vunpack.i.h.bf16 %v4603_v29 }
 0x3f1   :  { %v1038_v54 = vmul.f32 1.442695, %v1021_v25 }
 0x3f2   :  { %v1036_v24 = vmul.f32 1.442695, %v1020_v32 }
 0x3f3   :  { %v983_v28 = vpop.xlane.xlu0 %982  ;;  %v980_v57 = vpop.xlane.xlu1 %979 }
 0x3f4   :  { %3726 = vpow2.f32 %v1036_v24  ;;  %v1023_v35 = vsub.f32 %v4535_v3, %v983_v28  ;;  %v1022_v44 = vsub.f32 %v4537_v4, %v980_v57  ;;  %3705 = vrot.lane.b32.xlu0 %v3704_v55, %s3900_s19 }
 0x3f5   :  { %3728 = vpow2.f32 %v1038_v54 }
 0x3f6   :  { %v1042_v63 = vmul.f32 1.442695, %v1023_v35  ;;  %v1040_v1 = vmul.f32 1.442695, %v1022_v44 }
 0x3f7   :  { %v989_v12 = vpop.xlane.xlu0 %988  ;;  %v986_v45 = vpop.xlane.xlu1 %985 }
 0x3f8   :  { %3730 = vpow2.f32 %v1042_v63  ;;  %v1025_v53 = vsub.f32 %v4543_v22, %v989_v12  ;;  %v1024_v13 = vsub.f32 %v4545_v58, %v986_v45 }
 0x3f9   :  { %3732 = vpow2.f32 %v1040_v1 }
 0x3fa   :  { %v1046_v6 = vmul.f32 1.442695, %v1025_v53  ;;  %v1044_v31 = vmul.f32 1.442695, %v1024_v13 }
 0x3fb   :  { %v995_v37 = vpop.xlane.xlu1 %994 }
 0x3fc   :  { %3734 = vpow2.f32 %v1046_v6  ;;  %v1027_v46 = vsub.f32 %v4551_v38, %v995_v37  ;;  %v3658_v38 = vunpack.i.h.bf16 %v4593_v20  ;;  %v3673_v6 = vunpack.i.h.bf16 %v4599_v52 }
 0x3fd   :  { %3736 = vpow2.f32 %v1044_v31  ;;  %v3672_v31 = vunpack.i.l.bf16 %v4599_v52 }
 0x3fe   :  { %v4666_v11 = vpop.eup %3726  ;;  %v1050_v4 = vmul.f32 1.442695, %v1027_v46 }
 0x3ff   :  { %v4668_v55 = vpop.eup %3728  ;;  %3138 = vmatprep.mubr.msk.f32.mxu0 %vm51_vm0, %v4666_v11  ;;  %v992_v2 = vpop.xlane.xlu1 %991 }
 0x400   :  { %v1026_v3 = vsub.f32 %v4553_v19, %v992_v2  ;;  %3139 = vmatmul.mubr.msk.f32.vlgmr.msra.gmra.mrb[14].mxu0 %vm51_vm0, %v4668_v55  ;;  %v3657_v19 = vunpack.i.l.bf16 %v4593_v20  ;;  %v3668_v20 = vunpack.i.h.bf16 %v4595_v39  ;;  %v3682_v2 = vunpack.i.l.bf16 %v4645_v21 }
 0x401   :  { %3479 = vmatpush3.bf16.xpose.msk.msra.mxu0 %vm4441_vm4, %v4461_v0 }
 0x402   :  { %v4678_v18 = vpop.eup %3730  ;;  %v1048_v22 = vmul.f32 1.442695, %v1026_v3  ;;  %3482 = vmatprep.subr.msk.bf16.mxu0 %vm4441_vm4, %v3480_v56  ;;  %v3486_v49 = vpack.c.bf16 %v3658_v38, %v3657_v19  ;;  %v3492_v54 = vpack.c.bf16 %v3668_v20, %v3667_v27 }
 0x403   :  { %v4682_v58 = vpop.eup %3732 }
 0x404   :  { %3738 = vpow2.f32 %v1048_v22  ;;  %3141 = vmatprep.mubr.msk.f32.mxu0 %vm51_vm0, %v4682_v58 }
 0x405   :  { %3740 = vpow2.f32 %v1050_v4  ;;  %3142 = vmatmul.mubr.msk.f32.gmra.mrb[16].mxu0 %vm51_vm0, %v4678_v18 }
 0x406   :  { %v4690_v0 = vpop.eup %3734 }
 0x407   :  { %v4692_v5 = vpop.eup %3736 }
 0x408   :  { %3144 = vmatprep.mubr.msk.f32.mxu0 %vm51_vm0, %v4692_v5 }
 0x409   :  { %3145 = vmatmul.mubr.msk.f32.gmra.mrb[18].mxu0 %vm51_vm0, %v4690_v0 }
 0x40a   :  { %3485 = vmatpush3.bf16.xpose.msk.msra.mxu0 %vm4441_vm4, %v3480_v56 }
 0x40b   :  { %3488 = vmatprep.subr.msk.bf16.mxu0 %vm4441_vm4, %v3486_v49 }
 0x40e   :  { %v4704_v40 = vpop.eup %3738  ;;  %v1001_v25 = vpop.xlane.xlu0 %1000 }
 0x40f   :  { %v4706_v30 = vpop.eup %3740  ;;  %v1029_v32 = vsub.f32 %v4559_v43, %v1001_v25  ;;  %3147 = vmatprep.mubr.msk.f32.mxu0 %vm51_vm0, %v4704_v40 }
 0x410   :  { %3148 = vmatmul.mubr.msk.f32.gmra.mrb[20].mxu0 %vm51_vm0, %v4706_v30 }
 0x411   :  { %3194 = vmatprep.mubr.msk.f32.mxu0 %vm673_vm3, %v4605_v7  ;;  %v1054_v24 = vmul.f32 1.442695, %v1029_v32 }
 0x412   :  { %3491 = vmatpush3.bf16.xpose.msk.msra.mxu0 %vm4441_vm4, %v3486_v49  ;;  %v998_v39 = vpop.xlane.xlu0 %997 }
 0x413   :  { %3494 = vmatprep.subr.msk.bf16.mxu0 %vm4441_vm4, %v3492_v54  ;;  %v1028_v43 = vsub.f32 %v4561_v16, %v998_v39  ;;  %v1004_v28 = vpop.xlane.xlu1 %1003  ;;  %3742 = vpow2.f32 %v1054_v24 }
 0x414   :  { %v1030_v57 = vsub.f32 %v4567_v50, %v1004_v28 }
 0x415   :  { %v1052_v35 = vmul.f32 1.442695, %v1028_v43 }
 0x416   :  { %v1056_v44 = vmul.f32 1.442695, %v1030_v57  ;;  %v1007_v63 = vpop.xlane.xlu0 %1006 }
 0x417   :  { %3744 = vpow2.f32 %v1052_v35  ;;  %v1031_v7 = vsub.f32 %v4565_v47, %v1007_v63  ;;  %v1010_v1 = vpop.xlane.xlu1 %1009 }
 0x418   :  { %3746 = vpow2.f32 %v1056_v44  ;;  %v1032_v12 = vsub.f32 %v4575_v51, %v1010_v1 }
 0x419   :  { %v1058_v45 = vmul.f32 1.442695, %v1031_v7 }
 0x41a   :  { %v1060_v53 = vmul.f32 1.442695, %v1032_v12  ;;  %3497 = vmatpush3.bf16.xpose.msk.msra.mxu0 %vm4441_vm4, %v3492_v54  ;;  %v1013_v16 = vpop.xlane.xlu0 %1012 }
 0x41b   :  { %3748 = vpow2.f32 %v1058_v45  ;;  %v1033_v50 = vsub.f32 %v4573_v15, %v1013_v16  ;;  %v3504_v15 = vpack.c.bf16 %v3673_v6, %v3672_v31  ;;  %v1417_v17 = vpop.permute.xlu1 %1416 }
 0x41c   :  { %3750 = vpow2.f32 %v1060_v53 }
 0x41d   :  { %v1062_v13 = vmul.f32 1.442695, %v1033_v50  ;;  %v4728_v47 = vpop.eup %3742 }
 0x41f   :  { %3752 = vpow2.f32 %v1062_v13 }
 0x421   :  { %v4730_v37 = vpop.eup %3744  ;;  %3195 = vmatmul.mubr.msk.f32.vlgmr.msra.gmra.mrb[22].mxu0 %vm673_vm3, %v4609_v61 }
 0x422   :  { %v4734_v51 = vpop.eup %3746  ;;  %3197 = vmatprep.mubr.msk.f32.mxu0 %vm673_vm3, %v4615_v60  ;;  %3166 = vmatprep.mubr.msk.f32.mxu1 %vm51_vm0, %v4730_v37  ;;  %v1419_v60 = vpop.permute.xlu0 %1418 }
 0x423   :  { %3167 = vmatmul.mubr.msk.f32.vlgmr.msra.gmra.mrb[38].mxu1 %vm51_vm0, %v4728_v47 }
 0x424   :  { %3503 = vmatpush3.bf16.xpose.msk.msra.mxu1 %vm4441_vm4, %v4519_v14  ;;  %3169 = vmatprep.mubr.msk.f32.mxu1 %vm51_vm0, %v4734_v51  ;;  %v3677_v14 = vunpack.i.l.bf16 %v4603_v29  ;;  %v3683_v29 = vunpack.i.h.bf16 %v4645_v21 }
 0x425   :  { %v4747_v52 = vpop.eup %3748  ;;  %3198 = vmatmul.mubr.msk.f32.gmra.mrb[24].mxu0 %vm673_vm3, %v4623_v34  ;;  %3506 = vmatprep.subr.msk.bf16.mxu1 %vm4441_vm4, %v3504_v15 }
 0x426   :  { %v4753_v61 = vpop.eup %3750  ;;  %3200 = vmatprep.mubr.msk.f32.mxu0 %vm673_vm3, %v4637_v8  ;;  %v3510_v46 = vpack.c.bf16 %v3678_v23, %v3677_v14  ;;  %v1421_v8 = vpop.permute.xlu0 %1420  ;;  %v3516_v56 = vpack.c.bf16 %v3683_v29, %v3682_v2 }
 0x427   :  { %3170 = vmatmul.mubr.msk.f32.gmra.mrb[40].mxu1 %vm51_vm0, %v4747_v52 }
 0x428   :  { %3172 = vmatprep.mubr.msk.f32.mxu1 %vm51_vm0, %v4753_v61 }
 0x429   :  { %v4763_v34 = vpop.eup %3752  ;;  %3201 = vmatmul.mubr.msk.f32.gmra.mrb[26].mxu0 %vm673_vm3, %v1417_v17 }
 0x42a   :  { %3203 = vmatprep.mubr.msk.f32.mxu0 %vm673_vm3, %v1419_v60 }
 0x42b   :  { %3173 = vmatmul.mubr.msk.f32.gmra.mrb[42].mxu1 %vm51_vm0, %v4763_v34 }
 0x42c   :  { %3509 = vmatpush3.bf16.xpose.msk.msra.mxu1 %vm4441_vm4, %v3504_v15 }
 0x42d   :  { %3204 = vmatmul.mubr.msk.f32.gmra.mrb[28].mxu0 %vm673_vm3, %v1421_v8  ;;  %3512 = vmatprep.subr.msk.bf16.mxu1 %vm4441_vm4, %v3510_v46 }
 0x434   :  { %3515 = vmatpush3.bf16.xpose.msk.msra.mxu1 %vm4441_vm4, %v3510_v46 }
 0x435   :  { %3518 = vmatprep.subr.msk.bf16.mxu1 %vm4441_vm4, %v3516_v56 }
 0x43c   :  { %3521 = vmatpush3.bf16.xpose.msk.msra.mxu1 %vm4441_vm4, %v3516_v56 }
 0x44c   :  { %v1019_v3 = vpop.xlane.xlu1 %1018 }
 0x44d   :  { %v1035_v22 = vsub.f32 %v4581_v26, %v1019_v3 }
 0x44f   :  { %v1066_v20 = vmul.f32 1.442695, %v1035_v22 }
 0x450   :  { %v1580_v4 = vpop.permute.xlu1 %1579 }
 0x453   :  { %v1016_v38 = vpop.xlane.xlu0 %1015 }
 0x454   :  { %v1034_v19 = vsub.f32 %v4583_v62, %v1016_v38  ;;  %v1584_v49 = vpop.permute.xlu1 %1583 }
 0x456   :  { %v1064_v21 = vmul.f32 1.442695, %v1034_v19 }
 0x457   :  { %v1576_v27 = vpop.permute.xlu0 %1575 }
 0x458   :  { %3754 = vpow2.f32 %v1064_v21  ;;  %v1588_v25 = vpop.permute.xlu1 %1587 }
 0x459   :  { %3756 = vpow2.f32 %v1066_v20 }
 0x45b   :  { %v1578_v32 = vpop.permute.xlu0 %1577 }
 0x45c   :  { %v3686_v54 = vpop.permute.xlu1 %3685 }
 0x45d   :  { %v3688_v24 = vunpack.i.h.bf16 %v3686_v54  ;;  %v3687_v39 = vunpack.i.l.bf16 %v3686_v54 }
 0x45f   :  { %v3522_v10 = vpack.c.bf16 %v3688_v24, %v3687_v39  ;;  %v1582_v43 = vpop.permute.xlu0 %1581 }
 0x460   :  { %v3696_v28 = vpop.permute.xlu1 %3695 }
 0x461   :  { %3523 = vmatprep.subr.bf16.mxu0 %v3522_v10  ;;  %v3698_v63 = vunpack.i.h.bf16 %v3696_v28  ;;  %v3697_v7 = vunpack.i.l.bf16 %v3696_v28 }
 0x462   :  { %v4784_v57 = vpop.eup %3754  ;;  %3525 = vmatpush3.bf16.msra.mxu0 %v3522_v10 }
 0x463   :  { %v4786_v26 = vpop.eup %3756  ;;  %3175 = vmatprep.mubr.msk.f32.mxu1 %vm51_vm0, %v4784_v57  ;;  %v1586_v62 = vpop.permute.xlu0 %1585  ;;  %v3530_v50 = vpack.c.bf16 %v3698_v63, %v3697_v7 }
 0x464   :  { %3176 = vmatmul.mubr.msk.f32.gmra.mrb[44].mxu1 %vm51_vm0, %v4786_v26  ;;  %v3701_v35 = vpop.permute.xlu1 %3700 }
 0x465   :  { %3222 = vmatprep.mubr.msk.f32.mxu1 %vm673_vm3, %v1576_v27  ;;  %v3703_v13 = vunpack.i.h.bf16 %v3701_v35  ;;  %v3702_v6 = vunpack.i.l.bf16 %v3701_v35 }
 0x467   :  { %v1590_v44 = vpop.permute.xlu0 %1589  ;;  %v3534_v46 = vpack.c.bf16 %v3703_v13, %v3702_v6 }
 0x468   :  { %3223 = vmatmul.mubr.msk.f32.vlgmr.msra.gmra.mrb[46].mxu1 %vm673_vm3, %v1578_v32  ;;  %v3711_v53 = vpop.permute.xlu1 %3710 }
 0x469   :  { %3225 = vmatprep.mubr.msk.f32.mxu1 %vm673_vm3, %v1580_v4  ;;  %v3713_v15 = vunpack.i.h.bf16 %v3711_v53  ;;  %v3712_v60 = vunpack.i.l.bf16 %v3711_v53 }
 0x46b   :  { %v3691_v1 = vpop.permute.xlu0 %3690  ;;  %v3542_v8 = vpack.c.bf16 %v3713_v15, %v3712_v60 }
 0x46c   :  { %v3693_v12 = vunpack.i.h.bf16 %v3691_v1  ;;  %v3692_v45 = vunpack.i.l.bf16 %v3691_v1  ;;  %3226 = vmatmul.mubr.msk.f32.gmra.mrb[48].mxu1 %vm673_vm3, %v1582_v43 }
 0x46d   :  { %3228 = vmatprep.mubr.msk.f32.mxu1 %vm673_vm3, %v1584_v49 }
 0x46e   :  { %v3526_v16 = vpack.c.bf16 %v3693_v12, %v3692_v45 }
 0x46f   :  { %v3706_v31 = vpop.permute.xlu0 %3705 }
 0x470   :  { %v3708_v23 = vunpack.i.h.bf16 %v3706_v31  ;;  %v3707_v14 = vunpack.i.l.bf16 %v3706_v31  ;;  %3229 = vmatmul.mubr.msk.f32.gmra.mrb[50].mxu1 %vm673_vm3, %v1586_v62  ;;  %3527 = vmatprep.subr.bf16.mxu0 %v3526_v16 }
 0x471   :  { %3231 = vmatprep.mubr.msk.f32.mxu1 %vm673_vm3, %v1588_v25  ;;  %3529 = vmatpush3.bf16.msra.mxu0 %v3526_v16 }
 0x472   :  { %v3538_v17 = vpack.c.bf16 %v3708_v23, %v3707_v14  ;;  %3531 = vmatprep.subr.bf16.mxu0 %v3530_v50 }
 0x474   :  { %3232 = vmatmul.mubr.msk.f32.gmra.mrb[52].mxu1 %vm673_vm3, %v1590_v44  ;;  %3539 = vmatprep.subr.bf16.mxu1 %v3538_v17 }
 0x475   :  { %3533 = vmatpush3.bf16.msra.mxu0 %v3530_v50  ;;  %3541 = vmatpush3.bf16.msra.mxu1 %v3538_v17 }
 0x476   :  { %3535 = vmatprep.subr.bf16.mxu0 %v3534_v46  ;;  %3543 = vmatprep.subr.bf16.mxu1 %v3542_v8 }
 0x479   :  { %3537 = vmatpush3.bf16.msra.mxu0 %v3534_v46  ;;  %3545 = vmatpush3.bf16.msra.mxu1 %v3542_v8 }
 0x4d3   :  { %v4800_v29 = vpop.f32.mrb[14].mxu0 }
 0x4d4   :  { %v4802_v2 = vpop.f32.mrb[15].mxu0 }
 0x4d8   :  { %v4804_v56 = vpop.f32.mrb[16].mxu0 }
 0x4d9   :  { %v4806_v3 = vpop.f32.mrb[17].mxu0 }
 0x4dc   :  { %v4808_v4 = vpop.f32.mrb[18].mxu0 }
 0x4dd   :  { %v4810_v22 = vpop.f32.mrb[19].mxu0 }
 0x4e3   :  { %v4812_v38 = vpop.f32.mrb[20].mxu0 }
 0x4e4   :  { %v4814_v19 = vpop.f32.mrb[21].mxu0 }
 0x4f4   :  { %v3196_v49 = vpop.f32.mrb[22].mxu0 }
 0x4f5   :  { %v1536_v20 = vpop.f32.mrb[23].mxu0  ;;  %v1747_v21 = vsel %vm51_vm0, %v3196_v49, -inf }
 0x4f6   :  { %1748 = vmax.xlane.f32.xlu0 %v1747_v21  ;;  %v1744_v27 = vsel %vm51_vm0, %v1536_v20, -inf  ;;  %v4818_v25 = vpop.f32.mrb[38].mxu1 }
 0x4f7   :  { %1745 = vmax.xlane.f32.xlu1 %v1744_v27  ;;  %v4820_v32 = vpop.f32.mrb[39].mxu1 }
 0x4f8   :  { %v3199_v54 = vpop.f32.mrb[24].mxu0 }
 0x4f9   :  { %v1546_v24 = vpop.f32.mrb[25].mxu0  ;;  %v1753_v39 = vsel %vm51_vm0, %v3199_v54, -inf }
 0x4fa   :  { %v1750_v10 = vsel %vm51_vm0, %v1546_v24, -inf  ;;  %v4824_v43 = vpop.f32.mrb[40].mxu1 }
 0x4fb   :  { %1754 = vmax.xlane.f32.xlu1 %v1753_v39  ;;  %1751 = vmax.xlane.f32.xlu0 %v1750_v10  ;;  %v4826_v28 = vpop.f32.mrb[41].mxu1 }
 0x4fc   :  { %v3202_v62 = vpop.f32.mrb[26].mxu0 }
 0x4fd   :  { %v1556_v35 = vpop.f32.mrb[27].mxu0  ;;  %v1759_v44 = vsel %vm51_vm0, %v3202_v62, -inf }
 0x4fe   :  { %v1756_v63 = vsel %vm51_vm0, %v1556_v35, -inf  ;;  %v4830_v7 = vpop.f32.mrb[42].mxu1 }
 0x4ff   :  { %1760 = vmax.xlane.f32.xlu1 %v1759_v44  ;;  %1757 = vmax.xlane.f32.xlu0 %v1756_v63  ;;  %v4832_v1 = vpop.f32.mrb[43].mxu1 }
 0x500   :  { %v4834_v12 = vpop.f32.mrb[28].mxu0 }
 0x501   :  { %v4836_v45 = vpop.f32.mrb[29].mxu0  ;;  %v1765_v53 = vsel %vm51_vm0, %v4834_v12, -inf }
 0x502   :  { %v1762_v16 = vsel %vm51_vm0, %v4836_v45, -inf }
 0x503   :  { %1766 = vmax.xlane.f32.xlu0 %v1765_v53 }
 0x507   :  { %1763 = vmax.xlane.f32.xlu0 %v1762_v16 }
 0x537   :  { %v4842_v50 = vpop.f32.mrb[44].mxu1 }
 0x538   :  { %5133 = vst [vmem:[#allocation6_spill] sm:$0xff] %v4842_v50  ;;  %v4844_v13 = vpop.f32.mrb[45].mxu1 }
 0x539   :  { %5134 = vst [vmem:[#allocation7_spill] sm:$0xff] %v4844_v13 }
 0x53b   :  { %v4846_v6 = vpop.f32.mrb[46].mxu1 }
 0x53c   :  { %v4848_v31 = vpop.f32.mrb[47].mxu1  ;;  %v1771_v15 = vsel %vm51_vm0, %v4846_v6, -inf }
 0x53d   :  { %1772 = vmax.xlane.f32.xlu1 %v1771_v15  ;;  %v1768_v60 = vsel %vm51_vm0, %v4848_v31, -inf }
 0x53e   :  { %1769 = vmax.xlane.f32.xlu0 %v1768_v60 }
 0x53f   :  { %v4854_v23 = vpop.f32.mrb[48].mxu1 }
 0x540   :  { %v4856_v14 = vpop.f32.mrb[49].mxu1  ;;  %v1777_v17 = vsel %vm51_vm0, %v4854_v23, -inf }
 0x541   :  { %v1774_v21 = vsel %vm51_vm0, %v4856_v14, -inf }
 0x542   :  { %1778 = vmax.xlane.f32.xlu0 %v1777_v17 }
 0x543   :  { %v4860_v46 = vpop.f32.mrb[50].mxu1 }
 0x544   :  { %v4862_v8 = vpop.f32.mrb[51].mxu1  ;;  %v1783_v10 = vsel %vm51_vm0, %v4860_v46, -inf }
 0x545   :  { %v1780_v63 = vsel %vm51_vm0, %v4862_v8, -inf }
 0x546   :  { %1775 = vmax.xlane.f32.xlu0 %v1774_v21 }
 0x547   :  { %v4866_v27 = vpop.f32.mrb[52].mxu1 }
 0x548   :  { %v4868_v39 = vpop.f32.mrb[53].mxu1  ;;  %v1789_v53 = vsel %vm51_vm0, %v4866_v27, -inf }
 0x549   :  { %v1786_v44 = vsel %vm51_vm0, %v4868_v39, -inf }
 0x54a   :  { %1784 = vmax.xlane.f32.xlu0 %v1783_v10  ;;  %1787 = vmax.xlane.f32.xlu1 %v1786_v44 }
 0x54e   :  { %1781 = vmax.xlane.f32.xlu0 %v1780_v63 }
 0x552   :  { %1790 = vmax.xlane.f32.xlu0 %v1789_v53 }
 0x55b   :  { %3715 = vrot.lane.b32.xlu1 %v3714_v48, %s3900_s19 }
 0x568   :  { %3720 = vrot.lane.b32.xlu0 %v3719_v33, %s3900_s19 }
 0x583   :  { %v1749_v16 = vpop.xlane.xlu0 %1748 }
 0x584   :  { %v1793_v15 = vsub.f32 %v3196_v49, %v1749_v16  ;;  %v1746_v60 = vpop.xlane.xlu1 %1745 }
 0x585   :  { %v1792_v17 = vsub.f32 %v1536_v20, %v1746_v60 }
 0x586   :  { %v1810_v21 = vmul.f32 1.442695, %v1793_v15 }
 0x587   :  { %v1808_v10 = vmul.f32 1.442695, %v1792_v17 }
 0x588   :  { %3758 = vpow2.f32 %v1810_v21  ;;  %v1755_v44 = vpop.xlane.xlu1 %1754  ;;  %v1752_v63 = vpop.xlane.xlu0 %1751 }
 0x589   :  { %3760 = vpow2.f32 %v1808_v10  ;;  %v1795_v53 = vsub.f32 %v3199_v54, %v1755_v44  ;;  %v1794_v41 = vsub.f32 %v1546_v24, %v1752_v63 }
 0x58b   :  { %v1814_v50 = vmul.f32 1.442695, %v1795_v53  ;;  %v1812_v9 = vmul.f32 1.442695, %v1794_v41 }
 0x58c   :  { %v1761_v42 = vpop.xlane.xlu1 %1760  ;;  %v1758_v48 = vpop.xlane.xlu0 %1757 }
 0x58d   :  { %3762 = vpow2.f32 %v1814_v50  ;;  %v1797_v13 = vsub.f32 %v3202_v62, %v1761_v42  ;;  %v1796_v36 = vsub.f32 %v1556_v35, %v1758_v48  ;;  %v46_v48 = vld [vmem:[%s5125_s1 + $0x60] sm:$0xff] }
 0x58e   :  { %3764 = vpow2.f32 %v1812_v9 }
 0x58f   :  { %v1818_v59 = vmul.f32 1.442695, %v1797_v13  ;;  %v1816_v33 = vmul.f32 1.442695, %v1796_v36  ;;  %v47_v36 = vld [vmem:[%s5125_s1 + $0x68] sm:$0xff] }
 0x590   :  { %v1767_v49 = vpop.xlane.xlu0 %1766 }
 0x591   :  { %3766 = vpow2.f32 %v1818_v59  ;;  %v1799_v15 = vsub.f32 %v4834_v12, %v1767_v49  ;;  %v3554_v59 = vpack.c.bf16 %v47_v36, %v46_v48 }
 0x592   :  { %v3759_v20 = vpop.eup %3758  ;;  %3768 = vpow2.f32 %v1816_v33 }
 0x593   :  { %v3761_v16 = vpop.eup %3760  ;;  %v1843_v54 = vsel %vm51_vm0, %v3759_v20, 0.0  ;;  %v1822_v50 = vmul.f32 1.442695, %v1799_v15  ;;  %3555 = vmatprep.subr.bf16.mxu0 %v3554_v59 }
 0x594   :  { %3250 = vmatprep.mubr.msk.f32.mxu0 %vm51_vm0, %v3761_v16  ;;  %1844 = vadd.xlane.f32.xlu0 %v1843_v54  ;;  %v1764_v41 = vpop.xlane.xlu0 %1763  ;;  %v1840_v24 = vsel %vm51_vm0, %v3761_v16, 0.0 }
 0x595   :  { %v1798_v62 = vsub.f32 %v4836_v45, %v1764_v41  ;;  %1841 = vadd.xlane.f32.xlu1 %v1840_v24  ;;  %3251 = vmatmul.mubr.msk.f32.vlgmr.msra.gmra.mrb[30].mxu0 %vm51_vm0, %v3759_v20 }
 0x596   :  { %3557 = vmatpush3.bf16.msra.mxu0 %v3554_v59 }
 0x597   :  { %v3763_v35 = vpop.eup %3762  ;;  %v1820_v13 = vmul.f32 1.442695, %v1798_v62 }
 0x598   :  { %v3765_v60 = vpop.eup %3764  ;;  %v1849_v17 = vsel %vm51_vm0, %v3763_v35, 0.0 }
 0x599   :  { %3770 = vpow2.f32 %v1820_v13  ;;  %3253 = vmatprep.mubr.msk.f32.mxu0 %vm51_vm0, %v3765_v60  ;;  %1850 = vadd.xlane.f32.xlu1 %v1849_v17  ;;  %v1846_v45 = vsel %vm51_vm0, %v3765_v60, 0.0 }
 0x59a   :  { %3254 = vmatmul.mubr.msk.f32.gmra.mrb[32].mxu0 %vm51_vm0, %v3763_v35  ;;  %3772 = vpow2.f32 %v1822_v50 }
 0x59b   :  { %v3767_v12 = vpop.eup %3766 }
 0x59c   :  { %v3769_v21 = vpop.eup %3768  ;;  %v1855_v63 = vsel %vm51_vm0, %v3767_v12, 0.0 }
 0x59d   :  { %3256 = vmatprep.mubr.msk.f32.mxu0 %vm51_vm0, %v3769_v21  ;;  %1847 = vadd.xlane.f32.xlu1 %v1846_v45  ;;  %v1852_v10 = vsel %vm51_vm0, %v3769_v21, 0.0 }
 0x59e   :  { %3257 = vmatmul.mubr.msk.f32.gmra.mrb[34].mxu0 %vm51_vm0, %v3767_v12 }
 0x5a1   :  { %1853 = vadd.xlane.f32.xlu1 %v1852_v10 }
 0x5a3   :  { %v3771_v44 = vpop.eup %3770 }
 0x5a4   :  { %3259 = vmatprep.mubr.msk.f32.mxu0 %vm51_vm0, %v3771_v44  ;;  %v1858_v53 = vsel %vm51_vm0, %v3771_v44, 0.0  ;;  %v3773_v9 = vpop.eup %3772 }
 0x5a5   :  { %1856 = vadd.xlane.f32.xlu1 %v1855_v63  ;;  %1859 = vadd.xlane.f32.xlu0 %v1858_v53  ;;  %v1861_v42 = vsel %vm51_vm0, %v3773_v9, 0.0 }
 0x5a6   :  { %3260 = vmatmul.mubr.msk.f32.gmra.mrb[36].mxu0 %vm51_vm0, %v3773_v9 }
 0x5a9   :  { %1862 = vadd.xlane.f32.xlu1 %v1861_v42 }
 0x5ca   :  { %v1773_v33 = vpop.xlane.xlu1 %1772 }
 0x5cb   :  { %v1801_v49 = vsub.f32 %v4846_v6, %v1773_v33  ;;  %v1770_v20 = vpop.xlane.xlu0 %1769 }
 0x5cc   :  { %v1800_v16 = vsub.f32 %v4848_v31, %v1770_v20 }
 0x5cd   :  { %v1826_v15 = vmul.f32 1.442695, %v1801_v49 }
 0x5ce   :  { %v1824_v54 = vmul.f32 1.442695, %v1800_v16 }
 0x5cf   :  { %3774 = vpow2.f32 %v1826_v15  ;;  %v1779_v41 = vpop.xlane.xlu0 %1778 }
 0x5d0   :  { %3776 = vpow2.f32 %v1824_v54  ;;  %v1803_v24 = vsub.f32 %v4854_v23, %v1779_v41 }
 0x5d2   :  { %v1830_v62 = vmul.f32 1.442695, %v1803_v24 }
 0x5d3   :  { %v1776_v35 = vpop.xlane.xlu0 %1775 }
 0x5d4   :  { %3778 = vpow2.f32 %v1830_v62  ;;  %v1802_v50 = vsub.f32 %v4856_v14, %v1776_v35  ;;  %v48_v62 = vld [vmem:[%s5125_s1 + $0x70] sm:$0xff] }
 0x5d6   :  { %v1828_v13 = vmul.f32 1.442695, %v1802_v50 }
 0x5d7   :  { %v1788_v60 = vpop.xlane.xlu1 %1787  ;;  %v1785_v17 = vpop.xlane.xlu0 %1784 }
 0x5d8   :  { %3780 = vpow2.f32 %v1828_v13  ;;  %v1805_v6 = vsub.f32 %v4860_v46, %v1785_v17  ;;  %v1806_v21 = vsub.f32 %v4868_v39, %v1788_v60 }
 0x5d9   :  { %v3775_v12 = vpop.eup %3774 }
 0x5da   :  { %v3777_v31 = vpop.eup %3776  ;;  %v1834_v45 = vmul.f32 1.442695, %v1805_v6  ;;  %v1867_v10 = vsel %vm51_vm0, %v3775_v12, 0.0  ;;  %v1836_v42 = vmul.f32 1.442695, %v1806_v21 }
 0x5db   :  { %v3716_v44 = vpop.permute.xlu1 %3715  ;;  %1868 = vadd.xlane.f32.xlu1 %v1867_v10  ;;  %3278 = vmatprep.mubr.msk.f32.mxu1 %vm51_vm0, %v3777_v31  ;;  %v1782_v23 = vpop.xlane.xlu0 %1781  ;;  %v1864_v14 = vsel %vm51_vm0, %v3777_v31, 0.0  ;;  %v1071_v10 = vsel %vm51_vm0, %v4668_v55, 0.0  ;;  %v1083_v55 = vsel %vm51_vm0, %v4690_v0, 0.0  ;;  %v1098_v0 = vsel %vm51_vm0, %v4734_v51, 0.0  ;;  %v42_v51 = vld [vmem:[%s5125_s1 + $0x40] sm:$0xff] }
 0x5dc   :  { %v3718_v63 = vunpack.i.h.bf16 %v3716_v44  ;;  %v3717_v53 = vunpack.i.l.bf16 %v3716_v44  ;;  %v1804_v9 = vsub.f32 %v4862_v8, %v1782_v23  ;;  %1865 = vadd.xlane.f32.xlu0 %v1864_v14  ;;  %3782 = vpow2.f32 %v1834_v45 }
 0x5dd   :  { %v1068_v45 = vsel %vm51_vm0, %v4666_v11, 0.0  ;;  %v1077_v44 = vsel %vm51_vm0, %v4678_v18, 0.0  ;;  %v1080_v11 = vsel %vm51_vm0, %v4692_v5, 0.0  ;;  %v1086_v23 = vsel %vm51_vm0, %v4704_v40, 0.0 }
 0x5de   :  { %v3779_v46 = vpop.eup %3778  ;;  %v3546_v48 = vpack.c.bf16 %v3718_v63, %v3717_v53  ;;  %v1832_v39 = vmul.f32 1.442695, %v1804_v9  ;;  %v1092_v18 = vsel %vm51_vm0, %v4730_v37, 0.0  ;;  %v1095_v14 = vsel %vm51_vm0, %v4728_v47, 0.0 }
 0x5df   :  { %v1791_v36 = vpop.xlane.xlu0 %1790  ;;  %v1873_v59 = vsel %vm51_vm0, %v3779_v46, 0.0  ;;  %v1101_v5 = vsel %vm51_vm0, %v4747_v52, 0.0  ;;  %v1104_v40 = vsel %vm51_vm0, %v4753_v61, 0.0  ;;  %v1110_v47 = vsel %vm51_vm0, %v4784_v57, 0.0  ;;  %v43_v52 = vld [vmem:[%s5125_s1 + $0x48] sm:$0xff] }
 0x5e0   :  { %3784 = vpow2.f32 %v1832_v39  ;;  %v1807_v33 = vsub.f32 %v4866_v27, %v1791_v36  ;;  %1874 = vadd.xlane.f32.xlu1 %v1873_v59  ;;  %3547 = vmatprep.subr.bf16.mxu1 %v3546_v48  ;;  %v49_v27 = vld [vmem:[%s5125_s1 + $0x78] sm:$0xff]  ;;  %v1113_v37 = vsel %vm51_vm0, %v4786_v26, 0.0  ;;  %v3562_v61 = vpack.c.bf16 %v43_v52, %v42_v51 }
 0x5e1   :  { %3549 = vmatpush3.bf16.msra.mxu1 %v3546_v48  ;;  %3786 = vpow2.f32 %v1836_v42  ;;  %v3558_v50 = vpack.c.bf16 %v49_v27, %v48_v62  ;;  %v44_v42 = vld [vmem:[%s5125_s1 + $0x50] sm:$0xff]  ;;  %v45_v48 = vld [vmem:[%s5125_s1 + $0x58] sm:$0xff] }
 0x5e2   :  { %v3781_v49 = vpop.eup %3780  ;;  %v1838_v20 = vmul.f32 1.442695, %v1807_v33 }
 0x5e3   :  { %v3721_v16 = vpop.permute.xlu0 %3720  ;;  %v1870_v8 = vsel %vm51_vm0, %v3781_v49, 0.0  ;;  %3559 = vmatprep.subr.bf16.mxu0 %v3558_v50 }
 0x5e4   :  { %3788 = vpow2.f32 %v1838_v20  ;;  %v3723_v15 = vunpack.i.h.bf16 %v3721_v16  ;;  %v3722_v54 = vunpack.i.l.bf16 %v3721_v16  ;;  %1871 = vadd.xlane.f32.xlu0 %v1870_v8  ;;  %3561 = vmatpush3.bf16.msra.mxu0 %v3558_v50  ;;  %v3566_v20 = vpack.c.bf16 %v45_v48, %v44_v42 }
 0x5e5   :  { %3563 = vmatprep.subr.bf16.mxu0 %v3562_v61 }
 0x5e6   :  { %v3550_v41 = vpack.c.bf16 %v3723_v15, %v3722_v54  ;;  %v3783_v24 = vpop.eup %3782 }
 0x5e7   :  { %v1879_v35 = vsel %vm51_vm0, %v3783_v24, 0.0 }
 0x5e8   :  { %3551 = vmatprep.subr.bf16.mxu1 %v3550_v41  ;;  %1880 = vadd.xlane.f32.xlu1 %v1879_v35 }
 0x5e9   :  { %3553 = vmatpush3.bf16.msra.mxu1 %v3550_v41 }
 0x5ea   :  { %v3785_v13 = vpop.eup %3784 }
 0x5eb   :  { %v1876_v60 = vsel %vm51_vm0, %v3785_v13, 0.0  ;;  %v3787_v17 = vpop.eup %3786 }
 0x5ec   :  { %1877 = vadd.xlane.f32.xlu0 %v1876_v60  ;;  %3279 = vmatmul.mubr.msk.f32.vlgmr.msra.gmra.mrb[54].mxu1 %vm51_vm0, %v3775_v12  ;;  %v1882_v31 = vsel %vm51_vm0, %v3787_v17, 0.0  ;;  %v1074_v12 = vsel %vm51_vm0, %v4682_v58, 0.0  ;;  %v1089_v58 = vsel %vm51_vm0, %v4706_v30, 0.0  ;;  %v1107_v30 = vsel %vm51_vm0, %v4763_v34, 0.0 }
 0x5ed   :  { %3281 = vmatprep.mubr.msk.f32.mxu1 %vm51_vm0, %v3781_v49 }
 0x5ee   :  { %v3789_v6 = vpop.eup %3788 }
 0x5ef   :  { %v1885_v21 = vsel %vm51_vm0, %v3789_v6, 0.0 }
 0x5f0   :  { %1883 = vadd.xlane.f32.xlu0 %v1882_v31  ;;  %1886 = vadd.xlane.f32.xlu1 %v1885_v21 }
 0x5f1   :  { %3282 = vmatmul.mubr.msk.f32.gmra.mrb[56].mxu1 %vm51_vm0, %v3779_v46 }
 0x5f2   :  { %3284 = vmatprep.mubr.msk.f32.mxu1 %vm51_vm0, %v3785_v13 }
 0x5f4   :  { %1069 = vadd.xlane.f32.xlu0 %v1068_v45  ;;  %1072 = vadd.xlane.f32.xlu1 %v1071_v10 }
 0x5f5   :  { %3285 = vmatmul.mubr.msk.f32.gmra.mrb[58].mxu1 %vm51_vm0, %v3783_v24 }
 0x5f6   :  { %3287 = vmatprep.mubr.msk.f32.mxu1 %vm51_vm0, %v3787_v17 }
 0x5f8   :  { %1075 = vadd.xlane.f32.xlu0 %v1074_v12  ;;  %1078 = vadd.xlane.f32.xlu1 %v1077_v44 }
 0x5f9   :  { %3288 = vmatmul.mubr.msk.f32.gmra.mrb[60].mxu1 %vm51_vm0, %v3789_v6 }
 0x5fc   :  { %1081 = vadd.xlane.f32.xlu0 %v1080_v11  ;;  %1084 = vadd.xlane.f32.xlu1 %v1083_v55 }
 0x600   :  { %1087 = vadd.xlane.f32.xlu0 %v1086_v23  ;;  %1090 = vadd.xlane.f32.xlu1 %v1089_v58 }
 0x604   :  { %1093 = vadd.xlane.f32.xlu0 %v1092_v18  ;;  %1096 = vadd.xlane.f32.xlu1 %v1095_v14 }
 0x608   :  { %1099 = vadd.xlane.f32.xlu0 %v1098_v0  ;;  %1102 = vadd.xlane.f32.xlu1 %v1101_v5 }
 0x60c   :  { %1105 = vadd.xlane.f32.xlu0 %v1104_v40  ;;  %1108 = vadd.xlane.f32.xlu1 %v1107_v30 }
 0x610   :  { %1111 = vadd.xlane.f32.xlu0 %v1110_v47  ;;  %1114 = vadd.xlane.f32.xlu1 %v1113_v37 }
 0x621   :  { %v1845_v9 = vpop.xlane.xlu0 %1844 }
 0x622   :  { %v1842_v34 = vpop.xlane.xlu1 %1841 }
 0x623   :  { %3790 = vrcp.f32 %v1842_v34 }
 0x624   :  { %3792 = vrcp.f32 %v1845_v9 }
 0x626   :  { %v1851_v63 = vpop.xlane.xlu1 %1850 }
 0x62a   :  { %v1848_v53 = vpop.xlane.xlu1 %1847 }
 0x62b   :  { %3794 = vrcp.f32 %v1848_v53 }
 0x62c   :  { %3796 = vrcp.f32 %v1851_v63 }
 0x62d   :  { %v3791_v39 = vpop.eup %3790 }
 0x62e   :  { %v1854_v57 = vpop.xlane.xlu1 %1853  ;;  %v3793_v59 = vpop.eup %3792 }
 0x62f   :  { %3798 = vrcp.f32 %v1854_v57 }
 0x632   :  { %v1857_v26 = vpop.xlane.xlu1 %1856  ;;  %v1860_v16 = vpop.xlane.xlu0 %1859 }
 0x633   :  { %3800 = vrcp.f32 %v1857_v26 }
 0x634   :  { %3802 = vrcp.f32 %v1860_v16 }
 0x635   :  { %v3795_v15 = vpop.eup %3794 }
 0x636   :  { %v1863_v54 = vpop.xlane.xlu1 %1862  ;;  %v3797_v24 = vpop.eup %3796 }
 0x637   :  { %3804 = vrcp.f32 %v1863_v54 }
 0x639   :  { %v3799_v50 = vpop.eup %3798 }
 0x63d   :  { %v3801_v60 = vpop.eup %3800 }
 0x63e   :  { %v3803_v21 = vpop.eup %3802 }
 0x641   :  { %v3805_v10 = vpop.eup %3804 }
 0x668   :  { %v3252_v46 = vpop.f32.mrb[30].mxu0  ;;  %v1869_v55 = vpop.xlane.xlu1 %1868 }
 0x669   :  { %v2010_v36 = vpop.f32.mrb[31].mxu0  ;;  %v2227_v49 = vmul.f32 %v3793_v59, %v3252_v46  ;;  %v1866_v11 = vpop.xlane.xlu0 %1865 }
 0x66a   :  { %v2226_v33 = vmul.f32 %v3791_v39, %v2010_v36  ;;  %3806 = vrcp.f32 %v1866_v11 }
 0x66b   :  { %3808 = vrcp.f32 %v1869_v55 }
 0x66c   :  { %3298 = vmatprep.mubr.msk.f32.mxu0 %vm673_vm3, %v2226_v33 }
 0x66d   :  { %v3255_v8 = vpop.f32.mrb[32].mxu0  ;;  %3299 = vmatmul.mubr.msk.f32.vlgmr.msra.gmra.mrb[38].mxu0 %vm673_vm3, %v2227_v49  ;;  %v1875_v18 = vpop.xlane.xlu1 %1874 }
 0x66e   :  { %v2020_v41 = vpop.f32.mrb[33].mxu0  ;;  %3565 = vmatpush3.bf16.msra.mxu0 %v3562_v61  ;;  %v2229_v27 = vmul.f32 %v3797_v24, %v3255_v8 }
 0x66f   :  { %v2228_v62 = vmul.f32 %v3795_v15, %v2020_v41  ;;  %3567 = vmatprep.subr.bf16.mxu0 %v3566_v20 }
 0x671   :  { %v3258_v35 = vpop.f32.mrb[34].mxu0  ;;  %3301 = vmatprep.mubr.msk.f32.mxu0 %vm673_vm3, %v2228_v62  ;;  %v1872_v23 = vpop.xlane.xlu0 %1871 }
 0x672   :  { %v2030_v13 = vpop.f32.mrb[35].mxu0  ;;  %3302 = vmatmul.mubr.msk.f32.gmra.mrb[40].mxu0 %vm673_vm3, %v2229_v27  ;;  %v2231_v6 = vmul.f32 %v3801_v60, %v3258_v35  ;;  %3810 = vrcp.f32 %v1872_v23 }
 0x673   :  { %v2230_v17 = vmul.f32 %v3799_v50, %v2030_v13  ;;  %3569 = vmatpush3.bf16.msra.mxu0 %v3566_v20  ;;  %3812 = vrcp.f32 %v1875_v18 }
 0x674   :  { %v3807_v61 = vpop.eup %3806 }
 0x675   :  { %3304 = vmatprep.mubr.msk.f32.mxu0 %vm673_vm3, %v2230_v17  ;;  %v1881_v14 = vpop.xlane.xlu1 %1880  ;;  %v3809_v63 = vpop.eup %3808 }
 0x676   :  { %3305 = vmatmul.mubr.msk.f32.gmra.mrb[42].mxu0 %vm673_vm3, %v2231_v6 }
 0x679   :  { %v3261_v31 = vpop.f32.mrb[36].mxu0  ;;  %v1878_v58 = vpop.xlane.xlu0 %1877 }
 0x67a   :  { %v2040_v45 = vpop.f32.mrb[37].mxu0  ;;  %v2233_v44 = vmul.f32 %v3805_v10, %v3261_v31  ;;  %3814 = vrcp.f32 %v1878_v58 }
 0x67b   :  { %v2232_v12 = vmul.f32 %v3803_v21, %v2040_v45  ;;  %3816 = vrcp.f32 %v1881_v14 }
 0x67c   :  { %v3811_v42 = vpop.eup %3810 }
 0x67d   :  { %3307 = vmatprep.mubr.msk.f32.mxu0 %vm673_vm3, %v2232_v12  ;;  %v1884_v0 = vpop.xlane.xlu0 %1883  ;;  %v1887_v5 = vpop.xlane.xlu1 %1886 }
 0x67e   :  { %3308 = vmatmul.mubr.msk.f32.gmra.mrb[44].mxu0 %vm673_vm3, %v2233_v44  ;;  %3818 = vrcp.f32 %v1884_v0  ;;  %v3813_v39 = vpop.eup %3812 }
 0x681   :  { %v1070_v40 = vpop.xlane.xlu0 %1069  ;;  %v1073_v30 = vpop.xlane.xlu1 %1072 }
 0x682   :  { %3820 = vrcp.f32 %v1070_v40 }
 0x683   :  { %3822 = vrcp.f32 %v1887_v5 }
 0x684   :  { %3824 = vrcp.f32 %v1073_v30  ;;  %v3815_v20 = vpop.eup %3814 }
 0x685   :  { %v1076_v47 = vpop.xlane.xlu0 %1075  ;;  %v1079_v37 = vpop.xlane.xlu1 %1078 }
 0x686   :  { %3826 = vrcp.f32 %v1076_v47  ;;  %v3817_v8 = vpop.eup %3816 }
 0x687   :  { %3828 = vrcp.f32 %v1079_v37 }
 0x688   :  { %v3819_v24 = vpop.eup %3818 }
 0x689   :  { %v1082_v51 = vpop.xlane.xlu0 %1081  ;;  %v1085_v53 = vpop.xlane.xlu1 %1084 }
 0x68a   :  { %3830 = vrcp.f32 %v1082_v51 }
 0x68b   :  { %3832 = vrcp.f32 %v1085_v53 }
 0x68c   :  { %v3821_v27 = vpop.eup %3820 }
 0x68d   :  { %v1088_v26 = vpop.xlane.xlu0 %1087  ;;  %v1091_v59 = vpop.xlane.xlu1 %1090  ;;  %v1390_v21 = vmul.f32 %v3821_v27, %v4802_v2 }
 0x68e   :  { %v3823_v13 = vpop.eup %3822  ;;  %3834 = vrcp.f32 %v1088_v26 }
 0x68f   :  { %v3825_v6 = vpop.eup %3824  ;;  %3836 = vrcp.f32 %v1091_v59 }
 0x690   :  { %v3827_v45 = vpop.eup %3826  ;;  %v1391_v10 = vmul.f32 %v3825_v6, %v4800_v29 }
 0x691   :  { %v1094_v15 = vpop.xlane.xlu0 %1093  ;;  %v1097_v35 = vpop.xlane.xlu1 %1096  ;;  %v1392_v11 = vmul.f32 %v3827_v45, %v4806_v3 }
 0x692   :  { %3838 = vrcp.f32 %v1094_v15  ;;  %v3829_v44 = vpop.eup %3828 }
 0x693   :  { %3840 = vrcp.f32 %v1097_v35  ;;  %v1393_v2 = vmul.f32 %v3829_v44, %v4804_v56 }
 0x694   :  { %v3831_v55 = vpop.eup %3830 }
 0x695   :  { %v1100_v31 = vpop.xlane.xlu0 %1099  ;;  %v1103_v12 = vpop.xlane.xlu1 %1102  ;;  %v1394_v18 = vmul.f32 %v3831_v55, %v4810_v22 }
 0x696   :  { %3842 = vrcp.f32 %v1100_v31  ;;  %v3833_v58 = vpop.eup %3832  ;;  %v3860_v31 = vld [vmem:[%s5124_s0 + $0x38] sm:$0xff] }
 0x697   :  { %3844 = vrcp.f32 %v1103_v12  ;;  %v1395_v3 = vmul.f32 %v3833_v58, %v4808_v4 }
 0x698   :  { %v3835_v14 = vpop.eup %3834 }
 0x699   :  { %v1106_v23 = vpop.xlane.xlu0 %1105  ;;  %v1109_v29 = vpop.xlane.xlu1 %1108  ;;  %v1396_v40 = vmul.f32 %v3835_v14, %v4814_v19 }
 0x69a   :  { %3846 = vrcp.f32 %v1106_v23  ;;  %v3837_v0 = vpop.eup %3836  ;;  %v3862_v23 = vld [vmem:[%s5124_s0 + $0x48] sm:$0xff] }
 0x69b   :  { %3848 = vrcp.f32 %v1109_v29  ;;  %v1397_v22 = vmul.f32 %v3837_v0, %v4812_v38 }
 0x69c   :  { %v3839_v30 = vpop.eup %3838 }
 0x69d   :  { %v1112_v5 = vpop.xlane.xlu0 %1111  ;;  %v1115_v56 = vpop.xlane.xlu1 %1114  ;;  %v1398_v37 = vmul.f32 %v3839_v30, %v4820_v32 }
 0x69e   :  { %3850 = vrcp.f32 %v1112_v5  ;;  %v3841_v47 = vpop.eup %3840  ;;  %v3864_v5 = vld [vmem:[%s5124_s0 + $0x58] sm:$0xff] }
 0x69f   :  { %3852 = vrcp.f32 %v1115_v56  ;;  %v1399_v4 = vmul.f32 %v3841_v47, %v4818_v25  ;;  %v3865_v56 = vld [vmem:[%s5124_s0 + $0x50] sm:$0xff] }
 0x6a0   :  { %v3843_v51 = vpop.eup %3842 }
 0x6a1   :  { %v3845_v19 = vpop.eup %3844 }
 0x6a2   :  { %v1401_v38 = vmul.f32 %v3845_v19, %v4824_v43 }
 0x6bf   :  { %v3280_v52 = vpop.f32.mrb[54].mxu1 }
 0x6c0   :  { %v2171_v34 = vpop.f32.mrb[55].mxu1  ;;  %v2235_v57 = vmul.f32 %v3809_v63, %v3280_v52  ;;  %v1400_v52 = vmul.f32 %v3843_v51, %v4826_v28 }
 0x6c1   :  { %v2234_v9 = vmul.f32 %v3807_v61, %v2171_v34  ;;  %v3847_v61 = vpop.eup %3846 }
 0x6c2   :  { %v3849_v34 = vpop.eup %3848  ;;  %v1402_v32 = vmul.f32 %v3847_v61, %v4832_v1  ;;  %v3854_v1 = vld [vmem:[%s5124_s0 + $0x8] sm:$0xff]  ;;  %v3867_v61 = vld [vmem:[%s5124_s0 + $0x60] sm:$0xff] }
 0x6c3   :  { %3310 = vmatprep.mubr.msk.f32.mxu0 %vm673_vm3, %v2234_v9  ;;  %v3851_v63 = vpop.eup %3850  ;;  %v1403_v25 = vmul.f32 %v3849_v34, %v4830_v7  ;;  %v5135_v9 = vld [vmem:[#allocation7_spill] sm:$0xff]  ;;  %v3855_v7 = vld [vmem:[%s5124_s0] sm:$0xff] }
 0x6c4   :  { %v3283_v46 = vpop.f32.mrb[56].mxu1  ;;  %3311 = vmatmul.mubr.msk.f32.gmra.mrb[46].mxu0 %vm673_vm3, %v2235_v57  ;;  %v3853_v53 = vpop.eup %3852  ;;  %v1404_v28 = vmul.f32 %v3851_v63, %v5135_v9  ;;  %v5136_v57 = vld [vmem:[#allocation6_spill] sm:$0xff] }
 0x6c5   :  { %v2181_v48 = vpop.f32.mrb[57].mxu1  ;;  %v2237_v33 = vmul.f32 %v3813_v39, %v3283_v46  ;;  %v1405_v26 = vmul.f32 %v3853_v53, %v5136_v57  ;;  %v5137_v39 = vld [vmem:[#allocation5_spill] sm:$0xff] }
 0x6c6   :  { %v2236_v36 = vmul.f32 %v3811_v42, %v2181_v48 }
 0x6c8   :  { %v3286_v49 = vpop.f32.mrb[58].mxu1  ;;  %3313 = vmatprep.mubr.msk.f32.mxu0 %vm673_vm3, %v2236_v36 }
 0x6c9   :  { %v2191_v16 = vpop.f32.mrb[59].mxu1  ;;  %3314 = vmatmul.mubr.msk.f32.gmra.mrb[48].mxu0 %vm673_vm3, %v2237_v33  ;;  %v2239_v41 = vmul.f32 %v3817_v8, %v3286_v49  ;;  %v3856_v49 = vld [vmem:[%s5124_s0 + $0x18] sm:$0xff]  ;;  %v3857_v8 = vld [vmem:[%s5124_s0 + $0x10] sm:$0xff] }
 0x6ca   :  { %v2238_v54 = vmul.f32 %v3815_v20, %v2191_v16 }
 0x6cc   :  { %v3289_v62 = vpop.f32.mrb[60].mxu1  ;;  %3316 = vmatprep.mubr.msk.f32.mxu0 %vm673_vm3, %v2238_v54 }
 0x6cd   :  { %v2201_v50 = vpop.f32.mrb[61].mxu1  ;;  %3317 = vmatmul.mubr.msk.f32.gmra.mrb[50].mxu0 %vm673_vm3, %v2239_v41  ;;  %v2241_v17 = vmul.f32 %v3823_v13, %v3289_v62  ;;  %v3858_v62 = vld [vmem:[%s5124_s0 + $0x28] sm:$0xff] }
 0x6ce   :  { %v2240_v60 = vmul.f32 %v3819_v24, %v2201_v50  ;;  %v3859_v50 = vld [vmem:[%s5124_s0 + $0x20] sm:$0xff] }
 0x6d0   :  { %3319 = vmatprep.mubr.msk.f32.mxu0 %vm673_vm3, %v2240_v60 }
 0x6d1   :  { %3320 = vmatmul.mubr.msk.f32.gmra.mrb[52].mxu0 %vm673_vm3, %v2241_v17 }
 0x6d2   :  { %3330 = vmatprep.mubr.msk.f32.mxu0 %vm673_vm3, %v1390_v21 }
 0x6d5   :  { %3331 = vmatmul.mubr.msk.f32.vlgmr.msra.gmra.mrb[38].mxu0 %vm673_vm3, %v1391_v10  ;;  %v3861_v10 = vld [vmem:[%s5124_s0 + $0x30] sm:$0xff] }
 0x6d6   :  { %3333 = vmatprep.mubr.msk.f32.mxu0 %vm673_vm3, %v1392_v11 }
 0x6d9   :  { %3334 = vmatmul.mubr.msk.f32.gmra.mrb[40].mxu0 %vm673_vm3, %v1393_v2 }
 0x6da   :  { %3336 = vmatprep.mubr.msk.f32.mxu0 %vm673_vm3, %v1394_v18  ;;  %v3863_v18 = vld [vmem:[%s5124_s0 + $0x40] sm:$0xff] }
 0x6dd   :  { %3337 = vmatmul.mubr.msk.f32.gmra.mrb[42].mxu0 %vm673_vm3, %v1395_v3 }
 0x6de   :  { %3339 = vmatprep.mubr.msk.f32.mxu0 %vm673_vm3, %v1396_v40 }
 0x6e1   :  { %3340 = vmatmul.mubr.msk.f32.gmra.mrb[44].mxu0 %vm673_vm3, %v1397_v22 }
 0x6e2   :  { %3342 = vmatprep.mubr.msk.f32.mxu0 %vm673_vm3, %v1398_v37 }
 0x6e5   :  { %3343 = vmatmul.mubr.msk.f32.gmra.mrb[46].mxu0 %vm673_vm3, %v1399_v4  ;;  %v3866_v4 = vld [vmem:[%s5124_s0 + $0x68] sm:$0xff] }
 0x6e6   :  { %3345 = vmatprep.mubr.msk.f32.mxu0 %vm673_vm3, %v1400_v52 }
 0x6e9   :  { %3346 = vmatmul.mubr.msk.f32.gmra.mrb[48].mxu0 %vm673_vm3, %v1401_v38 }
 0x6ea   :  { %3348 = vmatprep.mubr.msk.f32.mxu0 %vm673_vm3, %v1402_v32 }
 0x6ed   :  { %3349 = vmatmul.mubr.msk.f32.gmra.mrb[50].mxu0 %vm673_vm3, %v1403_v25  ;;  %v3868_v25 = vld [vmem:[%s5124_s0 + $0x78] sm:$0xff] }
 0x6ee   :  { %3351 = vmatprep.mubr.msk.f32.mxu0 %vm673_vm3, %v1404_v28  ;;  %v3869_v28 = vld [vmem:[%s5124_s0 + $0x70] sm:$0xff] }
 0x6f1   :  { %3352 = vmatmul.mubr.msk.f32.gmra.mrb[52].mxu0 %vm673_vm3, %v1405_v26 }
 0x7a8   :  { %v3332_v43 = vpop.f32.mrb[38].mxu0 }
 0x7a9   :  { %v2629_v46 = vadd.f32 %v3854_v1, %v3332_v43  ;;  %v2549_v42 = vpop.f32.mrb[39].mxu0 }
 0x7aa   :  { %v2628_v48 = vadd.f32 %v3855_v7, %v2549_v42 }
 0x7ab   :  { %v2649_v36 = vadd.f32 %v5137_v39, %v2629_v46 }
 0x7ac   :  { %v2648_v59 = vadd.f32 %v5137_v39, %v2628_v48  ;;  %v3335_v33 = vpop.f32.mrb[40].mxu0 }
 0x7ad   :  { %2665 = vst.msk [vmem:[#allocation2 + $0x8] sm:$0xff] %vm51_vm0, %v2649_v36  ;;  %v2631_v20 = vadd.f32 %v3856_v49, %v3335_v33  ;;  %v2559_v16 = vpop.f32.mrb[41].mxu0 }
 0x7ae   :  { %2664 = vst.msk [vmem:[#allocation2] sm:$0xff] %vm51_vm0, %v2648_v59  ;;  %v2630_v15 = vadd.f32 %v3857_v8, %v2559_v16 }
 0x7af   :  { %v2651_v54 = vadd.f32 %v5137_v39, %v2631_v20 }
 0x7b0   :  { %v2650_v41 = vadd.f32 %v5137_v39, %v2630_v15  ;;  %v3338_v24 = vpop.f32.mrb[42].mxu0 }
 0x7b1   :  { %2667 = vst.msk [vmem:[#allocation2 + $0x18] sm:$0xff] %vm51_vm0, %v2651_v54  ;;  %v2633_v27 = vadd.f32 %v3858_v62, %v3338_v24  ;;  %v2569_v35 = vpop.f32.mrb[43].mxu0 }
 0x7b2   :  { %2666 = vst.msk [vmem:[#allocation2 + $0x10] sm:$0xff] %vm51_vm0, %v2650_v41  ;;  %v2632_v13 = vadd.f32 %v3859_v50, %v2569_v35 }
 0x7b3   :  { %v2653_v60 = vadd.f32 %v5137_v39, %v2633_v27 }
 0x7b4   :  { %v2652_v17 = vadd.f32 %v5137_v39, %v2632_v13  ;;  %v3341_v6 = vpop.f32.mrb[44].mxu0 }
 0x7b5   :  { %2669 = vst.msk [vmem:[#allocation2 + $0x28] sm:$0xff] %vm51_vm0, %v2653_v60  ;;  %v2635_v21 = vadd.f32 %v3860_v31, %v3341_v6  ;;  %v2579_v45 = vpop.f32.mrb[45].mxu0 }
 0x7b6   :  { %2668 = vst.msk [vmem:[#allocation2 + $0x20] sm:$0xff] %vm51_vm0, %v2652_v17  ;;  %v2634_v12 = vadd.f32 %v3861_v10, %v2579_v45 }
 0x7b7   :  { %v2655_v44 = vadd.f32 %v5137_v39, %v2635_v21 }
 0x7b8   :  { %v2654_v11 = vadd.f32 %v5137_v39, %v2634_v12  ;;  %v3344_v55 = vpop.f32.mrb[46].mxu0 }
 0x7b9   :  { %2671 = vst.msk [vmem:[#allocation2 + $0x38] sm:$0xff] %vm51_vm0, %v2655_v44  ;;  %v2637_v2 = vadd.f32 %v3862_v23, %v3344_v55  ;;  %v2589_v58 = vpop.f32.mrb[47].mxu0 }
 0x7ba   :  { %2670 = vst.msk [vmem:[#allocation2 + $0x30] sm:$0xff] %vm51_vm0, %v2654_v11  ;;  %v2636_v14 = vadd.f32 %v3863_v18, %v2589_v58 }
 0x7bb   :  { %v2657_v29 = vadd.f32 %v5137_v39, %v2637_v2 }
 0x7bc   :  { %v2656_v3 = vadd.f32 %v5137_v39, %v2636_v14  ;;  %v3347_v0 = vpop.f32.mrb[48].mxu0 }
 0x7bd   :  { %2673 = vst.msk [vmem:[#allocation2 + $0x48] sm:$0xff] %vm51_vm0, %v2657_v29  ;;  %v2639_v40 = vadd.f32 %v3864_v5, %v3347_v0  ;;  %v2599_v30 = vpop.f32.mrb[49].mxu0 }
 0x7be   :  { %2672 = vst.msk [vmem:[#allocation2 + $0x40] sm:$0xff] %vm51_vm0, %v2656_v3  ;;  %v2638_v22 = vadd.f32 %v3865_v56, %v2599_v30 }
 0x7bf   :  { %v2659_v47 = vadd.f32 %v5137_v39, %v2639_v40 }
 0x7c0   :  { %v2658_v37 = vadd.f32 %v5137_v39, %v2638_v22  ;;  %v3350_v51 = vpop.f32.mrb[50].mxu0 }
 0x7c1   :  { %2675 = vst.msk [vmem:[#allocation2 + $0x58] sm:$0xff] %vm51_vm0, %v2659_v47  ;;  %v2641_v19 = vadd.f32 %v3866_v4, %v3350_v51  ;;  %v2609_v52 = vpop.f32.mrb[51].mxu0 }
 0x7c2   :  { %2674 = vst.msk [vmem:[#allocation2 + $0x50] sm:$0xff] %vm51_vm0, %v2658_v37  ;;  %v2640_v38 = vadd.f32 %v3867_v61, %v2609_v52 }
 0x7c3   :  { %v2661_v34 = vadd.f32 %v5137_v39, %v2641_v19 }
 0x7c4   :  { %v2660_v32 = vadd.f32 %v5137_v39, %v2640_v38  ;;  %v3353_v63 = vpop.f32.mrb[52].mxu0 }
 0x7c5   :  { %2677 = vst.msk [vmem:[#allocation2 + $0x68] sm:$0xff] %vm51_vm0, %v2661_v34  ;;  %v2643_v53 = vadd.f32 %v3868_v25, %v3353_v63  ;;  %v2619_v9 = vpop.f32.mrb[53].mxu0 }
 0x7c6   :  { %2676 = vst.msk [vmem:[#allocation2 + $0x60] sm:$0xff] %vm51_vm0, %v2660_v32  ;;  %v2642_v57 = vadd.f32 %v3869_v28, %v2619_v9 }
 0x7c7   :  { %v2663_v26 = vadd.f32 %v5137_v39, %v2643_v53 }
 0x7c8   :  { %v2662_v43 = vadd.f32 %v5137_v39, %v2642_v57 }
 0x7c9   :  { %2679 = vst.msk [vmem:[#allocation2 + $0x78] sm:$0xff] %vm51_vm0, %v2663_v26 }
 0x7ca   :  { %2678 = vst.msk [vmem:[#allocation2 + $0x70] sm:$0xff] %vm51_vm0, %v2662_v43 }
 0x7cb   :  { %3881 = shalt.err (!%p3878_p4)
}
 0x7cc   :  { %s3882_s0 = scalar_lea.hbm %s5128_s4, 2048 }
 0x7cd   :  { %p3883_p5 = scmp.ne.s32.totalorder %s5128_s4, %s3882_s0  ;;  %p3886_p6 = scmp.lt.u32.totalorder %s3882_s0, %s5128_s4 }
 0x7cf   :  { %p3888_p7 = pnand %p3886_p6, %p3883_p5 }
 0x7d1   :  { %3891 = shalt.err (!%p3888_p7)
}
 0x7d2   :  { %s3902_s19 = smov 128   ;;  %s3903_s20 = smov 8  }
 0x7d3   :  { %2691 = dma.vmem_to_hbm [thread:$0]  %s2686_s10, 2048, %s5128_s4, [#allocation3], %s3902_s19, %s3902_s19, %s3903_s20  }
 0x7d4   :  { %3892 = dma.done.wait [#allocation3], 2048  }
 0x7d5   :  { %3893 = vsyncadd [#allocation3], 4294965248 }
 0x7d6   :  { %2695 = vsyncpa [#allocation3], 1 }

</bundles_post_ra>
